<compile_context>
chip_gen: v7x
topology: tpu7x:2x2x1
jax: 0.10.0
libtpu: 0.0.40
codegen_flags: <defaults>
</compile_context>

<pallas_src>
import functools
import math

import jax
import jax.numpy as jnp
from jax import lax
from jax.experimental import pallas as pl
from jax.experimental.pallas import tpu as pltpu


_MASK_VALUE = -1e30            # large finite negative; -inf would break the running max
_VMEM_LIMIT = 64 * 1024 * 1024


# ------------------------------ Linear kernel ------------------------------- #

def _linear_kernel(x_ref, w_ref, b_ref, o_ref):
    # x_ref: (1, tm, Cin)  w_ref: (Cin, tn)  b_ref: (1, tn)  o_ref: (1, tm, tn)
    y = jnp.dot(x_ref[0], w_ref[...], preferred_element_type=jnp.float32)
    o_ref[0] = (y + b_ref[...].astype(jnp.float32)).astype(o_ref.dtype)


def pallas_linear(x, w, b, *, tm_max=512, tn_max=512,
                  weight_resident_bytes=8 * 1024 * 1024):
    """(B, N, Cin) @ (Cin, Cout) + (Cout,) -> (B, N, Cout).

    Grid order is (batch, weight-column tile, row tile) so the weight block
    index never changes across the innermost (row) axis: the weight is DMAed at
    most B * (Cout / tn) times instead of B * (N / tm) * (Cout / tn).  When the
    whole weight fits the VMEM budget it stays fully resident (one DMA total).
    """
    B, N, Cin = x.shape
    Cout = w.shape[1]
    tm = N if N <= tm_max else tm_max                    # tm_max multiple of 8
    if Cin * Cout * w.dtype.itemsize <= weight_resident_bytes:
        tn = Cout                                        # whole weight resident
    else:
        tn = Cout if Cout <= tn_max else tn_max          # tn_max multiple of 128
    grid = (B, pl.cdiv(Cout, tn), pl.cdiv(N, tm))
    return pl.pallas_call(
        _linear_kernel,
        out_shape=jax.ShapeDtypeStruct((B, N, Cout), x.dtype),
        grid=grid,
        in_specs=[
            pl.BlockSpec((1, tm, Cin), lambda bb, j, i: (bb, i, 0)),
            pl.BlockSpec((Cin, tn), lambda bb, j, i: (0, j)),
            pl.BlockSpec((1, tn), lambda bb, j, i: (0, j)),
        ],
        out_specs=pl.BlockSpec((1, tm, tn), lambda bb, j, i: (bb, i, j)),
        compiler_params=pltpu.CompilerParams(
            dimension_semantics=("parallel", "parallel", "parallel"),
            vmem_limit_bytes=_VMEM_LIMIT),
    )(x, w, b.reshape(1, Cout))


# ---------------- Masked (cross-segment) flash-attention kernel -------------- #

def _masked_flash_kernel(q_ref, k_ref, v_ref, o_ref, m_sc, l_sc, acc_sc, q_sc, *,
                         split, seq_len, scale, exp_dtype, kv_edge):
    # q_ref: (1, tq, D)   k_ref/v_ref: (1, tk, D)   o_ref: (1, tq, D)
    # m_sc/l_sc: (tq, 1) f32   acc_sc: (tq, D) f32   q_sc: (tq, D) q-dtype
    _, tq, _ = q_ref.shape
    _, tk, _ = k_ref.shape
    i = pl.program_id(2)
    j = pl.program_id(3)

    @pl.when(j == 0)
    def _init():
        m_sc[...] = jnp.full(m_sc.shape, -jnp.inf, dtype=jnp.float32)
        l_sc[...] = jnp.zeros(l_sc.shape, dtype=jnp.float32)
        acc_sc[...] = jnp.zeros(acc_sc.shape, dtype=jnp.float32)
        q_sc[...] = q_ref[0] * scale          # softmax scale folded into q, once per q tile

    q_lo = i * tq
    kv_lo = j * tk
    # Whole-tile skip: the kv tile lies entirely in the same segment as every row
    # of the q tile -> nothing can be accumulated.  (Its DMA is also deduplicated
    # by the clamped kv index_map in the wrapper.)
    same_a = jnp.logical_and(q_lo + tq <= split, kv_lo + tk <= split)
    same_b = jnp.logical_and(q_lo >= split, kv_lo >= split)
    skip = jnp.logical_or(same_a, same_b)

    @pl.when(jnp.logical_not(skip))
    def _accumulate():
        kb = k_ref[0]                                    # (tk, D), native dtype
        vb = v_ref[0]                                    # (tk, D)

        rows = q_lo + lax.broadcasted_iota(jnp.int32, (tq, 1), 0)
        cols = kv_lo + lax.broadcasted_iota(jnp.int32, (1, tk), 1)
        # Queries in segment A attend only to keys in segment B and vice versa.
        allowed = jnp.logical_xor(rows < split, cols < split)
        if kv_edge:  # static flag: only emitted when seq_len % tk != 0
            allowed = jnp.logical_and(allowed, cols < seq_len)
            kv_rows = kv_lo + lax.broadcasted_iota(jnp.int32, (tk, 1), 0)
            # Zero out-of-range V rows: their p is 0, but 0 * (Inf/NaN padding)
            # would still poison the PV matmul.
            vb = jnp.where(kv_rows < seq_len, vb, jnp.zeros_like(vb))

        s = lax.dot_general(q_sc[...], kb, (((1,), (1,)), ((), ())),
                            preferred_element_type=jnp.float32)       # (tq, tk)
        s = jnp.where(allowed, s, _MASK_VALUE)

        m_prev = m_sc[...]
        m_new = jnp.maximum(m_prev, jnp.max(s, axis=-1, keepdims=True))
        alpha = jnp.exp(m_prev - m_new)                                # f32
        p = jnp.exp((s - m_new).astype(exp_dtype))                     # bf16 on bf16 runs
        l_sc[...] = alpha * l_sc[...] + jnp.sum(
            p, axis=-1, keepdims=True, dtype=jnp.float32)
        pv = lax.dot_general(p.astype(vb.dtype), vb, (((1,), (0,)), ((), ())),
                             preferred_element_type=jnp.float32)       # (tq, D)
        acc_sc[...] = alpha * acc_sc[...] + pv
        m_sc[...] = m_new

    @pl.when(j == pl.num_programs(3) - 1)
    def _finalize():
        o_ref[0] = (acc_sc[...] / l_sc[...]).astype(o_ref.dtype)


def pallas_masking_attention(qkv, num_heads, split, *, tq_max=512, tk_max=512):
    """Segment-swapped SDPA over a fused (B, N, 3C) qkv activation.

    Rows [0, split) attend to keys/values of rows [split, N) and vice versa.
    Returns (B, N, C) already in the `x.transpose(1, 2).reshape(B, N, C)`
    head-major column layout (head h -> columns [h*D, (h+1)*D)).
    """
    B, N, C3 = qkv.shape
    C = C3 // 3
    assert C3 == 3 * C and C % num_heads == 0
    D = C // num_heads
    assert D % 128 == 0, "head_dim must be a multiple of 128 (lane-aligned head blocks)"
    # TODO(synk): head_dim < 128 would need several heads packed per column block.
    assert 0 < split < N, "split must lie strictly inside the sequence"
    scale = D ** (-0.5)

    tq = N if N <= tq_max else tq_max            # tq_max multiple of 8
    tk = N if N <= tk_max else tk_max            # tk_max multiple of 8
    n_q = pl.cdiv(N, tq)
    n_kv = pl.cdiv(N, tk)
    kv_edge = (N % tk) != 0
    # bf16 exp when activations are bf16 (v6e/v7x EUP); f32 exp otherwise (v5e).
    exp_dtype = jnp.bfloat16 if qkv.dtype == jnp.bfloat16 else jnp.float32

    j_first_b = split // tk              # first kv tile containing segment-B keys
    j_last_a = (split - 1) // tk         # last kv tile containing segment-A keys

    def kv_block(i, j):
        # Clamp the kv block index over steps the kernel skips so the block index
        # does not change between consecutive steps and Pallas skips the re-DMA.
        q_all_a = (i + 1) * tq <= split
        q_all_b = i * tq >= split
        return jnp.where(q_all_a, jnp.maximum(j, j_first_b),
                         jnp.where(q_all_b, jnp.minimum(j, j_last_a), j))

    kernel = functools.partial(
        _masked_flash_kernel, split=split, seq_len=N, scale=scale,
        exp_dtype=exp_dtype, kv_edge=kv_edge)

    # Column-block layout of the fused qkv activation (block width = D):
    #   q head h -> block h, k head h -> block H + h, v head h -> block 2H + h.
    return pl.pallas_call(
        kernel,
        out_shape=jax.ShapeDtypeStruct((B, N, C), qkv.dtype),
        grid=(B, num_heads, n_q, n_kv),
        in_specs=[
            pl.BlockSpec((1, tq, D), lambda b, h, i, j: (b, i, h)),
            pl.BlockSpec((1, tk, D),
                         lambda b, h, i, j: (b, kv_block(i, j), num_heads + h)),
            pl.BlockSpec((1, tk, D),
                         lambda b, h, i, j: (b, kv_block(i, j), 2 * num_heads + h)),
        ],
        out_specs=pl.BlockSpec((1, tq, D), lambda b, h, i, j: (b, i, h)),
        scratch_shapes=[
            pltpu.VMEM((tq, 1), jnp.float32),     # running max
            pltpu.VMEM((tq, 1), jnp.float32),     # running sum
            pltpu.VMEM((tq, D), jnp.float32),     # output accumulator
            pltpu.VMEM((tq, D), qkv.dtype),       # scale-folded q tile cache
        ],
        compiler_params=pltpu.CompilerParams(
            dimension_semantics=("parallel", "parallel", "parallel", "arbitrary"),
            vmem_limit_bytes=_VMEM_LIMIT),
        # TODO(synk): sweep pl.Buffered(3) on the k/v specs and tq/tk on real
        # shapes; defaults keep double-buffering and 512-row tiles.
    )(qkv, qkv, qkv)


# ------------------------------- Forward pass -------------------------------- #

def masking_attention_forward(x, params, num_heads, split=1588, *,
                              tq_max=512, tk_max=512):
    """Pallas implementation of MaskingAttention.forward (eval mode)."""
    qkv = pallas_linear(x, params["w_qkv"], params["b_qkv"])              # (B, N, 3C)
    o = pallas_masking_attention(qkv, num_heads, split,
                                 tq_max=tq_max, tk_max=tk_max)            # (B, N, C)
    return pallas_linear(o, params["w_proj"], params["b_proj"])           # (B, N, C)


# ----------------------------- Reference (JAX) -------------------------------- #

def reference_forward(x, params, num_heads, split):
    B, N, C = x.shape
    D = C // num_heads
    qkv = x @ params["w_qkv"] + params["b_qkv"]
    qkv = qkv.reshape(B, N, 3, num_heads, D).transpose(2, 0, 3, 1, 4)
    q, k, v = qkv[0], qkv[1], qkv[2]
    scale = D ** (-0.5)

    def sdpa(qq, kk, vv):
        s = jnp.einsum("bhqd,bhkd->bhqk", qq, kk) * scale
        p = jax.nn.softmax(s, axis=-1)
        return jnp.einsum("bhqk,bhkd->bhqd", p, vv)

    o1 = sdpa(q[:, :, :split], k[:, :, split:], v[:, :, split:])
    o2 = sdpa(q[:, :, split:], k[:, :, :split], v[:, :, :split])
    o = jnp.concatenate([o1, o2], axis=2)
    o = o.transpose(0, 2, 1, 3).reshape(B, N, C)
    return o @ params["w_proj"] + params["b_proj"]


# ---------------------------------- Main -------------------------------------- #

if __name__ == "__main__":
    # Small demo shapes.  D = C // num_heads = 128 keeps head blocks lane-aligned.
    # N=20, split=9 and 8-row tiles exercise: multi-tile grids, the straddling
    # q/kv boundary tiles, fully-skipped same-segment tiles (clamped index maps),
    # and the partial last kv tile (edge masking + V padding zeroing).
    B, N, C = 2, 20, 256
    num_heads = 2
    split = 9            # demo-scale stand-in for the module's hard-coded 1588

    key = jax.random.PRNGKey(0)
    kx, kw1, kb1, kw2, kb2 = jax.random.split(key, 5)

    x = jax.random.normal(kx, (B, N, C), dtype=jnp.float32)
    # Weights stored as (in, out); y = x @ W + b (matches nn.Linear's x @ W.T + b).
    params = {
        "w_qkv": jax.random.normal(kw1, (C, 3 * C), dtype=jnp.float32)
                 * (1.0 / math.sqrt(C)),
        "b_qkv": jax.random.normal(kb1, (3 * C,), dtype=jnp.float32) * 0.02,
        "w_proj": jax.random.normal(kw2, (C, C), dtype=jnp.float32)
                  * (1.0 / math.sqrt(C)),
        "b_proj": jax.random.normal(kb2, (C,), dtype=jnp.float32) * 0.02,
    }

    fwd = jax.jit(functools.partial(
        masking_attention_forward, num_heads=num_heads, split=split,
        tq_max=8, tk_max=8))

    # f32 run (tolerance covers TPU default matmul precision differences).
    out = jax.block_until_ready(fwd(x, params))
    ref = reference_forward(x, params, num_heads, split)
    assert out.shape == (B, N, C)
    assert jnp.allclose(out, ref, atol=2e-2, rtol=2e-2), "f32 mismatch vs reference"

    # bf16 run (production dtype for the MXU path); looser tolerance for bf16
    # rounding of activations/weights, checked against an f32 reference built
    # from the same bf16-cast inputs.
    xb = x.astype(jnp.bfloat16)
    pb = jax.tree_util.tree_map(lambda a: a.astype(jnp.bfloat16), params)
    outb = jax.block_until_ready(fwd(xb, pb))
    refb = reference_forward(
        xb.astype(jnp.float32),
        jax.tree_util.tree_map(lambda a: a.astype(jnp.float32), pb),
        num_heads, split)
    assert outb.shape == (B, N, C)
    assert jnp.allclose(outb.astype(jnp.float32), refb, atol=2e-1, rtol=1e-1), \
        "bf16 mismatch vs reference"

    print("KERNEL_OK")
</pallas_src>

<mosaic_0001>
module attributes {stable_mosaic.version = 11 : i64} {
  func.func @_linear_kernel(%arg0: i32, %arg1: i32, %arg2: i32, %arg3: memref<1x20x256xf32, #tpu.memory_space<vmem>>, %arg4: memref<256x768xf32, #tpu.memory_space<vmem>>, %arg5: memref<1x768xf32, #tpu.memory_space<vmem>>, %arg6: memref<1x20x768xf32, #tpu.memory_space<vmem>>) attributes {dimension_semantics = [#tpu.dimension_semantics<parallel>, #tpu.dimension_semantics<parallel>, #tpu.dimension_semantics<parallel>], iteration_bounds = array<i64: 2, 1, 1>, scalar_prefetch = 0 : i64, scratch_operands = 0 : i64, tpu.core_type = #tpu.core_type<tc>, window_params = [{transform_indices = @transform_0, window_bounds = array<i64: 1, 20, 256>}, {transform_indices = @transform_1, window_bounds = array<i64: 256, 768>}, {transform_indices = @transform_2, window_bounds = array<i64: 1, 768>}, {transform_indices = @transform_3, window_bounds = array<i64: 1, 20, 768>}]} {
    %c0 = arith.constant 0 : index
    %c0_0 = arith.constant 0 : index
    %c0_1 = arith.constant 0 : index
    %0 = vector.load %arg3[%c0, %c0_0, %c0_1] : memref<1x20x256xf32, #tpu.memory_space<vmem>>, vector<1x20x256xf32>
    %1 = vector.shape_cast %0 : vector<1x20x256xf32> to vector<20x256xf32>
    %c0_2 = arith.constant 0 : index
    %c0_3 = arith.constant 0 : index
    %2 = vector.load %arg4[%c0_2, %c0_3] : memref<256x768xf32, #tpu.memory_space<vmem>>, vector<256x768xf32>
    %cst = arith.constant dense<0.000000e+00> : vector<20x768xf32>
    %3 = tpu.matmul %1, %2, %cst {dimension_numbers = #tpu.dot_dimension_numbers<[1], [0], [0], [1], [0, 0, 1, 1], [], []>} : vector<20x256xf32>, vector<256x768xf32>, vector<20x768xf32> -> vector<20x768xf32>
    %c0_4 = arith.constant 0 : index
    %c0_5 = arith.constant 0 : index
    %4 = vector.load %arg5[%c0_4, %c0_5] : memref<1x768xf32, #tpu.memory_space<vmem>>, vector<1x768xf32>
    %5 = vector.broadcast %4 : vector<1x768xf32> to vector<20x768xf32>
    %6 = arith.addf %3, %5 : vector<20x768xf32>
    %c0_6 = arith.constant 0 : index
    %c0_7 = arith.constant 0 : index
    %c0_8 = arith.constant 0 : index
    %7 = vector.load %arg6[%c0_6, %c0_7, %c0_8] : memref<1x20x768xf32, #tpu.memory_space<vmem>>, vector<1x20x768xf32>
    %8 = vector.shape_cast %7 : vector<1x20x768xf32> to vector<20x768xf32>
    %9 = vector.shape_cast %6 : vector<20x768xf32> to vector<1x20x768xf32>
    tpu.vector_store %arg6[%c0_6, %c0_7, %c0_8], %9 {strides = array<i32>} : memref<1x20x768xf32, #tpu.memory_space<vmem>>, vector<1x20x768xf32>,
    return
  }
  func.func @transform_0(%arg0: i32, %arg1: i32, %arg2: i32) -> (i32, i32, i32) {
    %c0_i32 = arith.constant 0 : i32
    %c0_i32_0 = arith.constant 0 : i32
    return %arg0, %arg2, %c0_i32 : i32, i32, i32
  }
  func.func @transform_1(%arg0: i32, %arg1: i32, %arg2: i32) -> (i32, i32) {
    %c0_i32 = arith.constant 0 : i32
    %c0_i32_0 = arith.constant 0 : i32
    return %c0_i32, %arg1 : i32, i32
  }
  func.func @transform_2(%arg0: i32, %arg1: i32, %arg2: i32) -> (i32, i32) {
    %c0_i32 = arith.constant 0 : i32
    %c0_i32_0 = arith.constant 0 : i32
    return %c0_i32, %arg1 : i32, i32
  }
  func.func @transform_3(%arg0: i32, %arg1: i32, %arg2: i32) -> (i32, i32, i32) {
    %c0_i32 = arith.constant 0 : i32
    return %arg0, %arg2, %arg1 : i32, i32, i32
  }
}

module attributes {stable_mosaic.version = 11 : i64} {
  func.func @_masked_flash_kernel(%arg0: i32, %arg1: i32, %arg2: i32, %arg3: i32, %arg4: memref<1x8x128xf32, #tpu.memory_space<vmem>>, %arg5: memref<1x8x128xf32, #tpu.memory_space<vmem>>, %arg6: memref<1x8x128xf32, #tpu.memory_space<vmem>>, %arg7: memref<1x8x128xf32, #tpu.memory_space<vmem>>, %arg8: memref<8x1xf32, #tpu.memory_space<vmem>>, %arg9: memref<8x1xf32, #tpu.memory_space<vmem>>, %arg10: memref<8x128xf32, #tpu.memory_space<vmem>>, %arg11: memref<8x128xf32, #tpu.memory_space<vmem>>) attributes {dimension_semantics = [#tpu.dimension_semantics<parallel>, #tpu.dimension_semantics<parallel>, #tpu.dimension_semantics<parallel>, #tpu.dimension_semantics<arbitrary>], iteration_bounds = array<i64: 2, 2, 3, 3>, scalar_prefetch = 0 : i64, scratch_operands = 4 : i64, tpu.core_type = #tpu.core_type<tc>, window_params = [{transform_indices = @transform_0, window_bounds = array<i64: 1, 8, 128>}, {transform_indices = @transform_1, window_bounds = array<i64: 1, 8, 128>}, {transform_indices = @transform_2, window_bounds = array<i64: 1, 8, 128>}, {transform_indices = @transform_3, window_bounds = array<i64: 1, 8, 128>}]} {
    %c0_i32 = arith.constant 0 : i32
    %0 = arith.cmpi eq, %arg3, %c0_i32 : i32
    %1 = arith.extui %0 : i1 to i32
    %c0_i32_0 = arith.constant 0 : i32
    %2 = arith.cmpi ne, %1, %c0_i32_0 : i32
    scf.if %2 {
      %cst = arith.constant 0xFF800000 : f32
      %20 = vector.broadcast %cst : f32 to vector<8x1xf32>
      %c0 = arith.constant 0 : index
      %c0_9 = arith.constant 0 : index
      %21 = vector.load %arg8[%c0, %c0_9] : memref<8x1xf32, #tpu.memory_space<vmem>>, vector<8x1xf32>
      tpu.vector_store %arg8[%c0, %c0_9], %20 {strides = array<i32>} : memref<8x1xf32, #tpu.memory_space<vmem>>, vector<8x1xf32>,
      %cst_10 = arith.constant 0.000000e+00 : f32
      %22 = vector.broadcast %cst_10 : f32 to vector<8x1xf32>
      %c0_11 = arith.constant 0 : index
      %c0_12 = arith.constant 0 : index
      %23 = vector.load %arg9[%c0_11, %c0_12] : memref<8x1xf32, #tpu.memory_space<vmem>>, vector<8x1xf32>
      tpu.vector_store %arg9[%c0_11, %c0_12], %22 {strides = array<i32>} : memref<8x1xf32, #tpu.memory_space<vmem>>, vector<8x1xf32>,
      %cst_13 = arith.constant 0.000000e+00 : f32
      %24 = vector.broadcast %cst_13 : f32 to vector<8x128xf32>
      %c0_14 = arith.constant 0 : index
      %c0_15 = arith.constant 0 : index
      %25 = vector.load %arg10[%c0_14, %c0_15] : memref<8x128xf32, #tpu.memory_space<vmem>>, vector<8x128xf32>
      tpu.vector_store %arg10[%c0_14, %c0_15], %24 {strides = array<i32>} : memref<8x128xf32, #tpu.memory_space<vmem>>, vector<8x128xf32>,
      %c0_16 = arith.constant 0 : index
      %c0_17 = arith.constant 0 : index
      %c0_18 = arith.constant 0 : index
      %26 = vector.load %arg4[%c0_16, %c0_17, %c0_18] : memref<1x8x128xf32, #tpu.memory_space<vmem>>, vector<1x8x128xf32>
      %27 = vector.shape_cast %26 : vector<1x8x128xf32> to vector<8x128xf32>
      %cst_19 = arith.constant 0.0883883461 : f32
      %28 = vector.broadcast %cst_19 : f32 to vector<8x128xf32>
      %29 = arith.mulf %27, %28 : vector<8x128xf32>
      %c0_20 = arith.constant 0 : index
      %c0_21 = arith.constant 0 : index
      %30 = vector.load %arg11[%c0_20, %c0_21] : memref<8x128xf32, #tpu.memory_space<vmem>>, vector<8x128xf32>
      tpu.vector_store %arg11[%c0_20, %c0_21], %29 {strides = array<i32>} : memref<8x128xf32, #tpu.memory_space<vmem>>, vector<8x128xf32>,
    } else {
    }
    %c8_i32 = arith.constant 8 : i32
    %3 = arith.muli %arg2, %c8_i32 : i32
    %c8_i32_1 = arith.constant 8 : i32
    %4 = arith.muli %arg3, %c8_i32_1 : i32
    %c8_i32_2 = arith.constant 8 : i32
    %5 = arith.addi %3, %c8_i32_2 : i32
    %c9_i32 = arith.constant 9 : i32
    %6 = arith.cmpi sle, %5, %c9_i32 : i32
    %c8_i32_3 = arith.constant 8 : i32
    %7 = arith.addi %4, %c8_i32_3 : i32
    %c9_i32_4 = arith.constant 9 : i32
    %8 = arith.cmpi sle, %7, %c9_i32_4 : i32
    %9 = arith.andi %6, %8 : i1
    %c9_i32_5 = arith.constant 9 : i32
    %10 = arith.cmpi sge, %3, %c9_i32_5 : i32
    %c9_i32_6 = arith.constant 9 : i32
    %11 = arith.cmpi sge, %4, %c9_i32_6 : i32
    %12 = arith.andi %10, %11 : i1
    %13 = arith.ori %9, %12 : i1
    %true = arith.constant true
    %14 = arith.xori %13, %true : i1
    %15 = arith.extui %14 : i1 to i32
    %c0_i32_7 = arith.constant 0 : i32
    %16 = arith.cmpi ne, %15, %c0_i32_7 : i32
    scf.if %16 {
      %c0 = arith.constant 0 : index
      %c0_9 = arith.constant 0 : index
      %c0_10 = arith.constant 0 : index
      %20 = vector.load %arg5[%c0, %c0_9, %c0_10] : memref<1x8x128xf32, #tpu.memory_space<vmem>>, vector<1x8x128xf32>
      %21 = vector.shape_cast %20 : vector<1x8x128xf32> to vector<8x128xf32>
      %c0_11 = arith.constant 0 : index
      %c0_12 = arith.constant 0 : index
      %c0_13 = arith.constant 0 : index
      %22 = vector.load %arg6[%c0_11, %c0_12, %c0_13] : memref<1x8x128xf32, #tpu.memory_space<vmem>>, vector<1x8x128xf32>
      %23 = vector.shape_cast %22 : vector<1x8x128xf32> to vector<8x128xf32>
      %24 = tpu.iota {dimensions = array<i32: 0>} : vector<8x1xi32>
      %25 = vector.broadcast %3 : i32 to vector<8x1xi32>
      %26 = arith.addi %25, %24 : vector<8x1xi32>
      %27 = tpu.iota {dimensions = array<i32: 1>} : vector<1x8xi32>
      %28 = vector.broadcast %4 : i32 to vector<1x8xi32>
      %29 = arith.addi %28, %27 : vector<1x8xi32>
      %c9_i32_14 = arith.constant 9 : i32
      %30 = vector.broadcast %c9_i32_14 : i32 to vector<8x1xi32>
      %31 = arith.cmpi slt, %26, %30 : vector<8x1xi32>
      %c9_i32_15 = arith.constant 9 : i32
      %32 = vector.broadcast %c9_i32_15 : i32 to vector<1x8xi32>
      %33 = arith.cmpi slt, %29, %32 : vector<1x8xi32>
      %34 = vector.broadcast %31 : vector<8x1xi1> to vector<8x8xi1>
      %35 = vector.broadcast %33 : vector<1x8xi1> to vector<8x8xi1>
      %36 = arith.xori %34, %35 : vector<8x8xi1>
      %c20_i32 = arith.constant 20 : i32
      %37 = vector.broadcast %c20_i32 : i32 to vector<1x8xi32>
      %38 = arith.cmpi slt, %29, %37 : vector<1x8xi32>
      %39 = vector.broadcast %38 : vector<1x8xi1> to vector<8x8xi1>
      %40 = arith.andi %36, %39 : vector<8x8xi1>
      %41 = tpu.iota {dimensions = array<i32: 0>} : vector<8x1xi32>
      %42 = vector.broadcast %4 : i32 to vector<8x1xi32>
      %43 = arith.addi %42, %41 : vector<8x1xi32>
      %c20_i32_16 = arith.constant 20 : i32
      %44 = vector.broadcast %c20_i32_16 : i32 to vector<8x1xi32>
      %45 = arith.cmpi slt, %43, %44 : vector<8x1xi32>
      %cst = arith.constant 0.000000e+00 : f32
      %46 = vector.broadcast %cst : f32 to vector<8x128xf32>
      %47 = vector.shape_cast %45 : vector<8x1xi1> to vector<8x1xi1>
      %48 = vector.broadcast %47 : vector<8x1xi1> to vector<8x128xi1>
      %49 = arith.select %48, %23, %46 : vector<8x128xi1>, vector<8x128xf32>
      %c0_17 = arith.constant 0 : index
      %c0_18 = arith.constant 0 : index
      %50 = vector.load %arg11[%c0_17, %c0_18] : memref<8x128xf32, #tpu.memory_space<vmem>>, vector<8x128xf32>
      %cst_19 = arith.constant dense<0.000000e+00> : vector<8x8xf32>
      %51 = tpu.matmul %50, %21, %cst_19 {dimension_numbers = #tpu.dot_dimension_numbers<[1], [1], [0], [0], [0, 0, 1, 0], [], []>} : vector<8x128xf32>, vector<8x128xf32>, vector<8x8xf32> -> vector<8x8xf32>
      %cst_20 = arith.constant -1.000000e+30 : f32
      %52 = vector.broadcast %cst_20 : f32 to vector<8x8xf32>
      %53 = arith.select %40, %51, %52 : vector<8x8xi1>, vector<8x8xf32>
      %c0_21 = arith.constant 0 : index
      %c0_22 = arith.constant 0 : index
      %54 = vector.load %arg8[%c0_21, %c0_22] : memref<8x1xf32, #tpu.memory_space<vmem>>, vector<8x1xf32>
      %cst_23 = arith.constant dense<0xFF800000> : vector<8xf32>
      %55 = vector.multi_reduction <maximumf>, %53, %cst_23 [1] : vector<8x8xf32> to vector<8xf32>
      %56 = vector.shape_cast %55 : vector<8xf32> to vector<8x1xf32>
      %57 = arith.maximumf %54, %56 : vector<8x1xf32>
      %58 = arith.subf %54, %57 : vector<8x1xf32>
      %59 = math.exp %58 : vector<8x1xf32>
      %60 = vector.broadcast %57 : vector<8x1xf32> to vector<8x8xf32>
      %61 = arith.subf %53, %60 : vector<8x8xf32>
      %62 = math.exp %61 : vector<8x8xf32>
      %c0_24 = arith.constant 0 : index
      %c0_25 = arith.constant 0 : index
      %63 = vector.load %arg9[%c0_24, %c0_25] : memref<8x1xf32, #tpu.memory_space<vmem>>, vector<8x1xf32>
      %64 = arith.mulf %59, %63 : vector<8x1xf32>
      %cst_26 = arith.constant dense<0.000000e+00> : vector<8xf32>
      %65 = vector.multi_reduction <add>, %62, %cst_26 [1] : vector<8x8xf32> to vector<8xf32>
      %66 = vector.shape_cast %65 : vector<8xf32> to vector<8x1xf32>
      %67 = arith.addf %64, %66 : vector<8x1xf32>
      %c0_27 = arith.constant 0 : index
      %c0_28 = arith.constant 0 : index
      %68 = vector.load %arg9[%c0_27, %c0_28] : memref<8x1xf32, #tpu.memory_space<vmem>>, vector<8x1xf32>
      tpu.vector_store %arg9[%c0_27, %c0_28], %67 {strides = array<i32>} : memref<8x1xf32, #tpu.memory_space<vmem>>, vector<8x1xf32>,
      %cst_29 = arith.constant dense<0.000000e+00> : vector<8x128xf32>
      %69 = tpu.matmul %62, %49, %cst_29 {dimension_numbers = #tpu.dot_dimension_numbers<[1], [0], [0], [1], [0, 0, 1, 1], [], []>} : vector<8x8xf32>, vector<8x128xf32>, vector<8x128xf32> -> vector<8x128xf32>
      %c0_30 = arith.constant 0 : index
      %c0_31 = arith.constant 0 : index
      %70 = vector.load %arg10[%c0_30, %c0_31] : memref<8x128xf32, #tpu.memory_space<vmem>>, vector<8x128xf32>
      %71 = vector.broadcast %59 : vector<8x1xf32> to vector<8x128xf32>
      %72 = arith.mulf %71, %70 : vector<8x128xf32>
      %73 = arith.addf %72, %69 : vector<8x128xf32>
      %c0_32 = arith.constant 0 : index
      %c0_33 = arith.constant 0 : index
      %74 = vector.load %arg10[%c0_32, %c0_33] : memref<8x128xf32, #tpu.memory_space<vmem>>, vector<8x128xf32>
      tpu.vector_store %arg10[%c0_32, %c0_33], %73 {strides = array<i32>} : memref<8x128xf32, #tpu.memory_space<vmem>>, vector<8x128xf32>,
      %c0_34 = arith.constant 0 : index
      %c0_35 = arith.constant 0 : index
      %75 = vector.load %arg8[%c0_34, %c0_35] : memref<8x1xf32, #tpu.memory_space<vmem>>, vector<8x1xf32>
      tpu.vector_store %arg8[%c0_34, %c0_35], %57 {strides = array<i32>} : memref<8x1xf32, #tpu.memory_space<vmem>>, vector<8x1xf32>,
    } else {
    }
    %c2_i32 = arith.constant 2 : i32
    %17 = arith.cmpi eq, %arg3, %c2_i32 : i32
    %18 = arith.extui %17 : i1 to i32
    %c0_i32_8 = arith.constant 0 : i32
    %19 = arith.cmpi ne, %18, %c0_i32_8 : i32
    scf.if %19 {
      %c0 = arith.constant 0 : index
      %c0_9 = arith.constant 0 : index
      %20 = vector.load %arg10[%c0, %c0_9] : memref<8x128xf32, #tpu.memory_space<vmem>>, vector<8x128xf32>
      %c0_10 = arith.constant 0 : index
      %c0_11 = arith.constant 0 : index
      %21 = vector.load %arg9[%c0_10, %c0_11] : memref<8x1xf32, #tpu.memory_space<vmem>>, vector<8x1xf32>
      %22 = vector.broadcast %21 : vector<8x1xf32> to vector<8x128xf32>
      %23 = arith.divf %20, %22 : vector<8x128xf32>
      %c0_12 = arith.constant 0 : index
      %c0_13 = arith.constant 0 : index
      %c0_14 = arith.constant 0 : index
      %24 = vector.load %arg7[%c0_12, %c0_13, %c0_14] : memref<1x8x128xf32, #tpu.memory_space<vmem>>, vector<1x8x128xf32>
      %25 = vector.shape_cast %24 : vector<1x8x128xf32> to vector<8x128xf32>
      %26 = vector.shape_cast %23 : vector<8x128xf32> to vector<1x8x128xf32>
      tpu.vector_store %arg7[%c0_12, %c0_13, %c0_14], %26 {strides = array<i32>} : memref<1x8x128xf32, #tpu.memory_space<vmem>>, vector<1x8x128xf32>,
    } else {
    }
    return
  }
  func.func @transform_0(%arg0: i32, %arg1: i32, %arg2: i32, %arg3: i32) -> (i32, i32, i32) {
    %c0_i32 = arith.constant 0 : i32
    return %arg0, %arg2, %arg1 : i32, i32, i32
  }
  func.func @transform_1(%arg0: i32, %arg1: i32, %arg2: i32, %arg3: i32) -> (i32, i32, i32) {
    %c1_i32 = arith.constant 1 : i32
    %0 = arith.addi %arg2, %c1_i32 : i32
    %c8_i32 = arith.constant 8 : i32
    %1 = arith.muli %0, %c8_i32 : i32
    %c9_i32 = arith.constant 9 : i32
    %2 = arith.cmpi sle, %1, %c9_i32 : i32
    %c8_i32_0 = arith.constant 8 : i32
    %3 = arith.muli %arg2, %c8_i32_0 : i32
    %c9_i32_1 = arith.constant 9 : i32
    %4 = arith.cmpi sge, %3, %c9_i32_1 : i32
    %c1_i32_2 = arith.constant 1 : i32
    %5 = arith.maxsi %arg3, %c1_i32_2 : i32
    %c1_i32_3 = arith.constant 1 : i32
    %6 = arith.minsi %arg3, %c1_i32_3 : i32
    %7 = arith.select %4, %6, %arg3 : i32
    %8 = arith.select %2, %5, %7 : i32
    %c2_i32 = arith.constant 2 : i32
    %9 = arith.addi %c2_i32, %arg1 : i32
    %c0_i32 = arith.constant 0 : i32
    return %arg0, %8, %9 : i32, i32, i32
  }
  func.func @transform_2(%arg0: i32, %arg1: i32, %arg2: i32, %arg3: i32) -> (i32, i32, i32) {
    %c1_i32 = arith.constant 1 : i32
    %0 = arith.addi %arg2, %c1_i32 : i32
    %c8_i32 = arith.constant 8 : i32
    %1 = arith.muli %0, %c8_i32 : i32
    %c9_i32 = arith.constant 9 : i32
    %2 = arith.cmpi sle, %1, %c9_i32 : i32
    %c8_i32_0 = arith.constant 8 : i32
    %3 = arith.muli %arg2, %c8_i32_0 : i32
    %c9_i32_1 = arith.constant 9 : i32
    %4 = arith.cmpi sge, %3, %c9_i32_1 : i32
    %c1_i32_2 = arith.constant 1 : i32
    %5 = arith.maxsi %arg3, %c1_i32_2 : i32
    %c1_i32_3 = arith.constant 1 : i32
    %6 = arith.minsi %arg3, %c1_i32_3 : i32
    %7 = arith.select %4, %6, %arg3 : i32
    %8 = arith.select %2, %5, %7 : i32
    %c4_i32 = arith.constant 4 : i32
    %9 = arith.addi %c4_i32, %arg1 : i32
    %c0_i32 = arith.constant 0 : i32
    return %arg0, %8, %9 : i32, i32, i32
  }
  func.func @transform_3(%arg0: i32, %arg1: i32, %arg2: i32, %arg3: i32) -> (i32, i32, i32) {
    %c0_i32 = arith.constant 0 : i32
    return %arg0, %arg2, %arg1 : i32, i32, i32
  }
}

module attributes {stable_mosaic.version = 11 : i64} {
  func.func @_linear_kernel(%arg0: i32, %arg1: i32, %arg2: i32, %arg3: memref<1x20x256xf32, #tpu.memory_space<vmem>>, %arg4: memref<256x256xf32, #tpu.memory_space<vmem>>, %arg5: memref<1x256xf32, #tpu.memory_space<vmem>>, %arg6: memref<1x20x256xf32, #tpu.memory_space<vmem>>) attributes {dimension_semantics = [#tpu.dimension_semantics<parallel>, #tpu.dimension_semantics<parallel>, #tpu.dimension_semantics<parallel>], iteration_bounds = array<i64: 2, 1, 1>, scalar_prefetch = 0 : i64, scratch_operands = 0 : i64, tpu.core_type = #tpu.core_type<tc>, window_params = [{transform_indices = @transform_0, window_bounds = array<i64: 1, 20, 256>}, {transform_indices = @transform_1, window_bounds = array<i64: 256, 256>}, {transform_indices = @transform_2, window_bounds = array<i64: 1, 256>}, {transform_indices = @transform_3, window_bounds = array<i64: 1, 20, 256>}]} {
    %c0 = arith.constant 0 : index
    %c0_0 = arith.constant 0 : index
    %c0_1 = arith.constant 0 : index
    %0 = vector.load %arg3[%c0, %c0_0, %c0_1] : memref<1x20x256xf32, #tpu.memory_space<vmem>>, vector<1x20x256xf32>
    %1 = vector.shape_cast %0 : vector<1x20x256xf32> to vector<20x256xf32>
    %c0_2 = arith.constant 0 : index
    %c0_3 = arith.constant 0 : index
    %2 = vector.load %arg4[%c0_2, %c0_3] : memref<256x256xf32, #tpu.memory_space<vmem>>, vector<256x256xf32>
    %cst = arith.constant dense<0.000000e+00> : vector<20x256xf32>
    %3 = tpu.matmul %1, %2, %cst {dimension_numbers = #tpu.dot_dimension_numbers<[1], [0], [0], [1], [0, 0, 1, 1], [], []>} : vector<20x256xf32>, vector<256x256xf32>, vector<20x256xf32> -> vector<20x256xf32>
    %c0_4 = arith.constant 0 : index
    %c0_5 = arith.constant 0 : index
    %4 = vector.load %arg5[%c0_4, %c0_5] : memref<1x256xf32, #tpu.memory_space<vmem>>, vector<1x256xf32>
    %5 = vector.broadcast %4 : vector<1x256xf32> to vector<20x256xf32>
    %6 = arith.addf %3, %5 : vector<20x256xf32>
    %c0_6 = arith.constant 0 : index
    %c0_7 = arith.constant 0 : index
    %c0_8 = arith.constant 0 : index
    %7 = vector.load %arg6[%c0_6, %c0_7, %c0_8] : memref<1x20x256xf32, #tpu.memory_space<vmem>>, vector<1x20x256xf32>
    %8 = vector.shape_cast %7 : vector<1x20x256xf32> to vector<20x256xf32>
    %9 = vector.shape_cast %6 : vector<20x256xf32> to vector<1x20x256xf32>
    tpu.vector_store %arg6[%c0_6, %c0_7, %c0_8], %9 {strides = array<i32>} : memref<1x20x256xf32, #tpu.memory_space<vmem>>, vector<1x20x256xf32>,
    return
  }
  func.func @transform_0(%arg0: i32, %arg1: i32, %arg2: i32) -> (i32, i32, i32) {
    %c0_i32 = arith.constant 0 : i32
    %c0_i32_0 = arith.constant 0 : i32
    return %arg0, %arg2, %c0_i32 : i32, i32, i32
  }
  func.func @transform_1(%arg0: i32, %arg1: i32, %arg2: i32) -> (i32, i32) {
    %c0_i32 = arith.constant 0 : i32
    %c0_i32_0 = arith.constant 0 : i32
    return %c0_i32, %arg1 : i32, i32
  }
  func.func @transform_2(%arg0: i32, %arg1: i32, %arg2: i32) -> (i32, i32) {
    %c0_i32 = arith.constant 0 : i32
    %c0_i32_0 = arith.constant 0 : i32
    return %c0_i32, %arg1 : i32, i32
  }
  func.func @transform_3(%arg0: i32, %arg1: i32, %arg2: i32) -> (i32, i32, i32) {
    %c0_i32 = arith.constant 0 : i32
    return %arg0, %arg2, %arg1 : i32, i32, i32
  }
}

</mosaic_0001>

<bundles_post_ra>
// kernel: masking_attention_forward.4
= control target key start
LH: loop header
LB: loop body
LE: loop exit
PB: predicated region body
PF: predicated region fallthrough
CT: control target
= control target key end

     0   :  { %s1895_s0 = inlined_call_operand.hbm [shape: f32[2,20,768], index: 0, kind: input, shape index: {}, may-alias: {0,1,2}]   ;;  %s1896_s1 = inlined_call_operand.hbm [shape: f32[2,20,768], index: 1, kind: input, shape index: {}, may-alias: {0,1,2}]   ;;  %s1897_s2 = inlined_call_operand.hbm [shape: f32[2,20,768], index: 2, kind: input, shape index: {}, may-alias: {0,1,2}]   ;;  %s1898_s3 = inlined_call_operand.hbm [shape: f32[2,20,256], index: 3, kind: output, shape index: {}]  }
   0x1   :  { %1917 = sst [smem:[#allocation33_spill]] %s1895_s0 }
   0x2   :  { %1918 = sst [smem:[#allocation34_spill]] %s1896_s1 }
   0x3   :  { %1919 = sst [smem:[#allocation35_spill]] %s1898_s3 }
   0x4   :  { %8 = vsyncpa [#allocation7], 0 }
   0x5   :  { %10 = vsyncpa [#allocation7 + $0x1], 0 }
   0x6   :  { %11 = vsyncpa [#allocation10], 0 }
   0x7   :  { %13 = vsyncpa [#allocation10 + $0x1], 0 }
   0x8   :  { %14 = vsyncpa [#allocation8], 0 }
   0x9   :  { %16 = vsyncpa [#allocation8 + $0x1], 0  ;;  %s1386_s12 = smov 0   ;;  %s1388_s13 = smov 0  }
   0xa   :  { %s1390_s14 = smov 0   ;;  %s1392_s15 = smov 0  }
   0xb   :  { %s1394_s16 = smov 0   ;;  %s1396_s17 = smov 0  }
   0xc   :  { %s1398_s18 = smov 0   ;;  %s1400_s19 = smov 0  }
   0xd   :  { %s1402_s20 = smov 0   ;;  %s1404_s21 = smov 0  }
   0xe   :  { %s1406_s22 = smov 0   ;;  %s1408_s23 = smov 0  }
   0xf   :  { %s1410_s24 = smov 0   ;;  %s1412_s25 = smov 0  }
  0x10   :  { %s1414_s26 = smov 0   ;;  %s1416_s27 = smov 0  }
  0x11   :  { %s1418_s28 = smov 0   ;;  %s1420_s29 = smov 0  }
  0x12 LB: > { %1920 = sst [smem:[#allocation17_spill]] %s1286_s12  ;;  %s1477_s30 = sadd.s32 4294967295, %s1354_s29   ;;  %s1354_s29 = sphi %s1420_s29, %s22_s29   ;;  %s1350_s28 = sphi %s1418_s28, %s2003_s28   ;;  %s1346_s27 = sphi %s1416_s27, %s2002_s27   ;;  %s1342_s26 = sphi %s1414_s26, %s2001_s26   ;;  %s1338_s25 = sphi %s1412_s25, %s1988_s25   ;;  %s1334_s24 = sphi %s1410_s24, %s2000_s24   ;;  %s1330_s23 = sphi %s1408_s23, %s1999_s23   ;;  %s1326_s22 = sphi %s1406_s22, %s1998_s22   ;;  %s1322_s21 = sphi %s1404_s21, %s1997_s21   ;;  %s1318_s20 = sphi %s1402_s20, %s1996_s20   ;;  %s1314_s19 = sphi %s1400_s19, %s1995_s19   ;;  %s1310_s18 = sphi %s1398_s18, %s1994_s18   ;;  %s1306_s17 = sphi %s1396_s17, %s1985_s17   ;;  %s1302_s16 = sphi %s1394_s16, %s1984_s16   ;;  %s1298_s15 = sphi %s1392_s15, %s1983_s15   ;;  %s1294_s14 = sphi %s1390_s14, %s1992_s14   ;;  %s1290_s13 = sphi %s1388_s13, %s1982_s13   ;;  %s1286_s12 = sphi %s1386_s12, %s1981_s12  }
  0x13   : > { %1921 = sst [smem:[#allocation18_spill]] %s1290_s13  ;;  %s37_s4 = sadd.s32 1, %s1338_s25 }
  0x14   : > { %1922 = sst [smem:[#allocation19_spill]] %s1294_s14  ;;  %p38_p0 = scmp.ge.s32.totalorder %s37_s4, 3 }
  0x15   : > { %1923 = sst [smem:[#allocation20_spill]] %s1302_s16  ;;  %s40_s5 = sadd.s32 1, %s1342_s26 }
  0x16   : > { %1924 = sst [smem:[#allocation21_spill]] %s1306_s17  ;;  %s44_s6 = sadd.s32 1, %s1346_s27 }
  0x17   : > { %1925 = sst [smem:[#allocation22_spill]] %s1322_s21  ;;  %s48_s7 = sadd.s32 1, %s1350_s28 }
  0x18   : > { %1926 = sst [smem:[#allocation23_spill]] %s1326_s22  ;;  %s2005_s4 = smov (%p38_p0, %s37_s4), 0 }
  0x19   : > { %1927 = sst [smem:[#allocation24_spill]] %s1330_s23  ;;  %s2007_s5 = smov (!%p38_p0, %s40_s5), %s1342_s26 }
  0x1a   : > { %1928 = sst [smem:[#allocation25_spill]] %s1334_s24  ;;  %p1911_p1 = scmp.eq.s32.totalorder %s1354_s29, 0 }
  0x1b   : > { %1929 = sst [smem:[#allocation26_spill]] %s1338_s25  ;;  %p1910_p2 = scmp.eq.s32.totalorder %s1477_s30, 0 }
  0x1c   : > { %1930 = sst [smem:[#allocation27_spill]] %s2005_s4  ;;  %p42_p3 = scmp.ge.s32.totalorder %s2007_s5, 3 }
  0x1d   : > { %s864_s8 = sshll.u32 %s1342_s26, 3  ;;  %p87_p7 = scmp.gt.s32.totalorder %s1338_s25, 1 }
  0x1e   : > { %s1489_s9 = sadd.s32 8, %s864_s8  ;;  %p1491_p4 = scmp.ge.s32.totalorder %s864_s8, 9 }
  0x1f   : > { %s2009_s5 = smov (%p42_p3, %s2007_s5), 0  ;;  %s2011_s6 = smov (!%p42_p3, %s44_s6), %s1346_s27 }
  0x20   : > { %1932 = sst [smem:[#allocation28_spill]] %s2009_s5  ;;  %s53_s11 = ssub.s32 %s1342_s26, %s2009_s5 }
  0x21   : > { %p84_p5 = scmp.le.s32.totalorder %s1489_s9, 9  ;;  %p46_p6 = scmp.ge.s32.totalorder %s2011_s6, 2 }
  0x22   : > { %p89_p8 = scmp.lt.s32.totalorder %s1338_s25, 1  ;;  %s93_s3 = sadd.s32 2, %s1346_s27 }
  0x23   : > { %s2013_s6 = smov (%p46_p6, %s2011_s6), 0  ;;  %s2015_s7 = smov (!%p46_p6, %s48_s7), %s1350_s28 }
  0x24   : > { %1933 = sst [smem:[#allocation29_spill]] %s2013_s6  ;;  %s55_s8 = ssub.s32 %s1346_s27, %s2013_s6 }
  0x25   : > { %s866_s24 = sshll.u32 %s2009_s5, 3  ;;  %p50_p9 = scmp.ge.s32.totalorder %s2015_s7, 2 }
  0x26   : > { %s867_s23 = sadd.s32 8, %s866_s24  ;;  %p1516_p11 = scmp.ge.s32.totalorder %s866_s24, 9 }
  0x27   : > { %s88_s22 = scalar_select %p87_p7, %s1338_s25, 1 }
  0x28   : > { %s2017_s7 = smov (%p50_p9, %s2015_s7), 0  ;;  %p96_p10 = scmp.le.s32.totalorder %s867_s23, 9 }
  0x29   : > { %1934 = sst [smem:[#allocation30_spill]] %s2017_s7  ;;  %s52_s12 = ssub.s32 %s1350_s28, %s2017_s7 }
  0x2a   : > { %s90_s21 = scalar_select %p89_p8, %s1338_s25, 1 }
  0x2b   : > { %s54_s13 = sor.u32 %s53_s11, %s52_s12  ;;  %p99_p12 = scmp.gt.s32.totalorder %s2005_s4, 1 }
  0x2c   : > { %s1520_s14 = sor.u32 %s55_s8, %s54_s13  ;;  %p101_p0 = scmp.lt.s32.totalorder %s2005_s4, 1 }
  0x2d   : > { %s2019_s21 = smov (!%p1491_p4, %s90_s21), %s1338_s25  ;;  %s105_s11 = sadd.s32 2, %s2013_s6 }
  0x2e   : > { %s100_s7 = scalar_select %p99_p12, %s2005_s4, 1 }
  0x2f   : > { %s2021_s22 = smov (!%p84_p5, %s88_s22), %s2019_s21  ;;  %s113_s0 = sadd.s32 1, %s1306_s17 }
  0x30   : > { %s102_s24 = scalar_select %p101_p0, %s2005_s4, 1 }
  0x31   : > { %s109_s13 = ssub.s32 %s93_s3, %s105_s11  ;;  %p120_p3 = scmp.ne.s32.totalorder %s1306_s17, %s1302_s16 }
  0x32   : > { %s2023_s24 = smov (!%p1516_p11, %s102_s24), %s2005_s4  ;;  %p126_p5 = scmp.ne.s32.totalorder %s1302_s16, %s1298_s15 }
  0x33   : > { %s2025_s7 = smov (!%p96_p10, %s100_s7), %s2023_s24  ;;  %p1544_p4 = por %p120_p3, %p1911_p1 }
  0x34   : > { %s107_s21 = ssub.s32 %s2021_s22, %s2025_s7  ;;  %s147_s10 = sadd.s32 4, %s1346_s27 }
  0x35   : > { %s108_s5 = sor.u32 %s107_s21, %s52_s12  ;;  %p1554_p6 = por %p126_p5, %p1910_p2 }
  0x36   : > { %s110_s23 = sor.u32 %s109_s13, %s108_s5  ;;  %s159_s8 = sadd.s32 4, %s2013_s6 }
  0x37   : > { %s1937_s3 = scalar_select %p1554_p6, 1, 0 }
  0x38   : > { %p111_p7 = scmp.eq.s32.totalorder %s110_s23, 0  ;;  %s163_s24 = ssub.s32 %s147_s10, %s159_s8 }
  0x39   : > { %s164_s11 = sor.u32 %s163_s24, %s108_s5  ;;  %p1909_p9 = scmp.lt.s32.totalorder %s1354_s29, 36 }
  0x3a   : > { %s1560_s4 = scalar_select %p111_p7, %s1306_s17, %s113_s0  }
  0x3b   : > { %p1562_p8 = scmp.eq.s32.totalorder %s164_s11, 0  ;;  %s891_s12 = smul.u32 18, %s1350_s28 }
  0x3c   : > { %1938 = sst [smem:[#allocation31_spill]] %s1560_s4  ;;  %s256_s7 = sand.u32 1, %s1354_s29  }
  0x3d   : > { %s258_s21 = sand.u32 1, %s1306_s17   ;;  %s711_s16 = smul.u32 6, %s2021_s22 }
  0x3e   : > { %s840_s25 = sshll.u32 %s258_s21, 3  ;;  %p1575_p10 = pnand %p1909_p9, %p1544_p4 }
  0x3f   : > { %s712_s0 = sadd.s32 %s1346_s27, %s711_s16  ;;  %s260_s10 = scalar_lea.vmem [#allocation9], %s840_s25 }
  0x40   : > { %s283_s5 = sshll.u32 %s260_s10, 4  ;;  %s714_s23 = sadd.s32 %s891_s12, %s712_s0  ;;  %s1582_s5 = int_to_ptr.vmem [resolvable:$true] %s283_s5 }
  0x41   : > { %s843_s8 = sshll.u32 %s714_s23, 7  ;;  %s1941_s1 = sld [smem:[#allocation34_spill]] }
  0x42   : > { %s1590_s6 = scalar_lea.hbm %s1897_s2, %s843_s8  ;;  %s1595_s16 = scalar_lea.sflag [#allocation10], %s256_s7 }
  0x43   : > { %p1078_p0 = pneg %p1575_p10 }
  0x47   : > { %s716_s22 = scalar_lea.hbm %s1941_s1, %s843_s8  ;;  %s1081_s23 = scalar_lea.hbm %s1941_s1, 4608 }
  0x48   : > { %s1592_s4 = scalar_lea.hbm %s716_s22, 256  ;;  %s1106_s25 = scalar_lea.hbm %s716_s22, 384 }
  0x49   : > { %p1077_p12 = scmp.ne.s32.totalorder %s1592_s4, %s1106_s25  ;;  %p1082_p5 = scmp.lt.u32.totalorder %s1592_s4, %s1941_s1 }
  0x4a   : > { %p1083_p7 = scmp.lt.u32.totalorder %s1081_s23, %s1106_s25  ;;  %p1085_p2 = scmp.lt.u32.totalorder %s1106_s25, %s1592_s4 }
  0x4b   : > { %p1079_p3 = pnand %p1078_p0, %p1077_p12 }
  0x4c   : > { %p1084_p9 = por %p1083_p7, %p1082_p5 }
  0x4d   : > { %p1080_p4 = pneg %p1079_p3 }
  0x4e   : > { %p1086_p1 = por %p1085_p2, %p1084_p9 }
  0x50   : > { %p1087_p13 = pnand %p1086_p1, %p1080_p4 }
  0x52   : > { %1090 = shalt.err (!%p1087_p13)
}
  0x53   : > { %s1091_s7 = scalar_lea.vmem %s1582_s5, 128  ;;  %s1356_s11 = smov [#allocation9]  }
  0x54   : > { %p1092_p12 = scmp.ne.s32.totalorder %s1582_s5, %s1091_s7  ;;  %s1096_s22 = sshll.u32 %s1356_s11, 4  ;;  %s1097_s22 = int_to_ptr.vmem [resolvable:$false] %s1096_s22 }
  0x55   : > { %s1098_s9 = scalar_lea.vmem %s1097_s22, 256  ;;  %p1099_p6 = scmp.lt.s32.totalorder %s1582_s5, %s1097_s22 }
  0x56   : > { %p1094_p3 = pnand %p1092_p12, %p1078_p0  ;;  %p1100_p5 = scmp.lt.s32.totalorder %s1098_s9, %s1091_s7 }
  0x58   : > { %p1095_p11 = pneg %p1094_p3  ;;  %p1101_p7 = por %p1100_p5, %p1099_p6 }
  0x5a   : > { %p1102_p2 = pnand %p1101_p7, %p1095_p11 }
  0x5c   : > { %1105 = shalt.err (!%p1102_p2)
}
  0x5d   : > { %907 = dma.hbm_to_vmem [thread:$0]  (!%p1575_p10), %s1592_s4, 128, %s1582_s5, %s1595_s16  }
  0x5e   : > { %p322_p1 = scmp.lt.s32.totalorder %s1354_s29, 37  ;;  %p1942_p13 = scmp.ge.s32.totalorder %s1354_s29, 1 }
  0x5f   : > { %s827_s21 = sadd.s32 4294967294, %s1354_s29   ;;  %s59_s25 = sadd.s32 1, %s1318_s20 }
  0x60   : > { %p1625_p6 = pnand %p1942_p13, %p322_p1  ;;  %p1944_p9 = scmp.eq.s32.totalorder %s1520_s14, 0 }
  0x61   : > { %p66_p11 = scmp.ne.s32.totalorder %s1318_s20, %s1314_s19  ;;  %p72_p0 = scmp.ne.s32.totalorder %s1314_s19, %s1310_s18 }
  0x62   : > { %s1943_s13 = scalar_select %p1625_p6, 1, 0 }
  0x63   : > { %s1634_s0 = scalar_select %p1944_p9, %s1318_s20, %s59_s25  }
  0x64   : > { %p208_p4 = scmp.eq.s32.totalorder %s1477_s30, 35  ;;  %p214_p12 = scmp.eq.s32.totalorder %s827_s21, 35 }
  0x65   : > { %1945 = sst [smem:[#allocation32_spill]] %s1634_s0  ;;  %p1946_p3 = scmp.eq.s32.totalorder %s1354_s29, 0 }
  0x66   : > { %p1948_p5 = scmp.eq.s32.totalorder %s1477_s30, 0  ;;  %p1653_p2 = por %p208_p4, %p66_p11 }
  0x67   : > { %p1643_p10 = por %p1946_p3, %p66_p11  ;;  %p1657_p1 = por %p214_p12, %p72_p0 }
  0x68   : > { %p1649_p7 = por %p1948_p5, %p72_p0  ;;  %s234_s23 = sand.u32 1, %s1318_s20  }
  0x69   : > { %s1950_s14 = scalar_select %p1653_p2, 1, 0 }
  0x6a   : > { %s1949_s5 = scalar_select %p1649_p7, 1, 0 }
  0x6b   : > { %s1951_s10 = scalar_select %p1657_p1, 1, 0 }
  0x6c   : > { %s890_s8 = smul.u32 6, %s1342_s26  ;;  %s838_s24 = sshll.u32 %s234_s23, 3 }
  0x6d   : > { %s238_s22 = scalar_lea.vmem [#allocation6], %s838_s24  ;;  %s1952_s0 = sld [smem:[#allocation33_spill]] }
  0x6e   : > { %s243_s7 = sadd.s32 %s1346_s27, %s890_s8  ;;  %s249_s9 = sshll.u32 %s238_s22, 4  ;;  %s1666_s9 = int_to_ptr.vmem [resolvable:$true] %s249_s9 }
  0x6f   : > { %s245_s11 = sadd.s32 %s891_s12, %s243_s7  ;;  %p1953_p13 = scmp.lt.s32.totalorder %s1354_s29, 36 }
  0x70   : > { %s839_s21 = sshll.u32 %s245_s11, 7  ;;  %s235_s12 = scalar_lea.sflag [#allocation7], %s234_s23 }
  0x71   : > { %p1677_p9 = pnand %p1953_p13, %p1643_p10 }
  0x73   : > { %s1671_s17 = scalar_lea.hbm %s1952_s0, %s839_s21  ;;  %p1109_p0 = pneg %p1677_p9 }
  0x74   : > { %s1107_s24 = scalar_lea.hbm %s1671_s17, 128  ;;  %s1112_s7 = scalar_lea.hbm %s1952_s0, 4608 }
  0x75   : > { %p1108_p11 = scmp.ne.s32.totalorder %s1671_s17, %s1107_s24  ;;  %p1113_p3 = scmp.lt.u32.totalorder %s1671_s17, %s1952_s0 }
  0x76   : > { %p1114_p10 = scmp.lt.u32.totalorder %s1112_s7, %s1107_s24  ;;  %p1116_p13 = scmp.lt.u32.totalorder %s1107_s24, %s1671_s17 }
  0x77   : > { %p1110_p4 = pnand %p1109_p0, %p1108_p11 }
  0x78   : > { %p1115_p5 = por %p1114_p10, %p1113_p3 }
  0x79   : > { %p1111_p12 = pneg %p1110_p4 }
  0x7a   : > { %p1117_p1 = por %p1116_p13, %p1115_p5 }
  0x7c   : > { %p1118_p2 = pnand %p1117_p1, %p1111_p12 }
  0x7e   : > { %1121 = shalt.err (!%p1118_p2)
}
  0x7f   : > { %s1122_s23 = scalar_lea.vmem %s1666_s9, 128  ;;  %s1357_s21 = smov [#allocation6]  }
  0x80   : > { %p1123_p11 = scmp.ne.s32.totalorder %s1666_s9, %s1122_s23  ;;  %s1127_s25 = sshll.u32 %s1357_s21, 4  ;;  %s1128_s25 = int_to_ptr.vmem [resolvable:$false] %s1127_s25 }
  0x81   : > { %s1129_s1 = scalar_lea.vmem %s1128_s25, 256  ;;  %p1130_p6 = scmp.lt.s32.totalorder %s1666_s9, %s1128_s25 }
  0x82   : > { %p1125_p4 = pnand %p1123_p11, %p1109_p0  ;;  %p1131_p3 = scmp.lt.s32.totalorder %s1129_s1, %s1122_s23 }
  0x84   : > { %p1126_p7 = pneg %p1125_p4  ;;  %p1132_p10 = por %p1131_p3, %p1130_p6 }
  0x86   : > { %p1133_p5 = pnand %p1132_p10, %p1126_p7 }
  0x88   : > { %1136 = shalt.err (!%p1133_p5)
}
  0x89   : > { %s1955_s24 = sld [smem:[#allocation19_spill]]  ;;  %s1956_s4 = sld [smem:[#allocation18_spill]] }
  0x8a   : > { %s1957_s7 = sld [smem:[#allocation17_spill]]  ;;  %p1958_p2 = scmp.eq.s32.totalorder %s1354_s29, 0 }
  0x8b   : > { %904 = dma.hbm_to_vmem [thread:$0]  (!%p1677_p9), %s1671_s17, 128, %s1666_s9, %s235_s12  }
  0x8c   : > { %p1959_p0 = scmp.eq.s32.totalorder %s1477_s30, 0  ;;  %s1726_s25 = scalar_lea.hbm %s1590_s6, 512 }
  0x8d   : > { %p1961_p13 = scmp.lt.s32.totalorder %s1354_s29, 36  ;;  %s1167_s12 = scalar_lea.hbm %s1590_s6, 640 }
  0x8e   : > { %p1143_p10 = scmp.lt.u32.totalorder %s1726_s25, %s1897_s2 }
  0x8f   : > { %s167_s11 = sadd.s32 1, %s1955_s24  ;;  %p174_p6 = scmp.ne.s32.totalorder %s1955_s24, %s1956_s4 }
  0x90   : > { %s1710_s22 = scalar_select %p1562_p8, %s1955_s24, %s167_s11  }
  0x91   : > { %p180_p7 = scmp.ne.s32.totalorder %s1956_s4, %s1957_s7  ;;  %s292_s8 = sand.u32 1, %s1955_s24  }
  0x92   : > { %p176_p1 = por %p174_p6, %p1958_p2  ;;  %s844_s21 = sshll.u32 %s292_s8, 3 }
  0x93   : > { %p1721_p12 = por %p180_p7, %p1959_p0  ;;  %s294_s15 = scalar_lea.vmem [#allocation11], %s844_s21 }
  0x94   : > { %p1730_p9 = pnand %p1961_p13, %p176_p1  ;;  %s317_s9 = sshll.u32 %s294_s15, 4  ;;  %s318_s9 = int_to_ptr.vmem [resolvable:$true] %s317_s9 }
  0x95   : > { %s1960_s23 = scalar_select %p1721_p12, 1, 0 }
  0x96   : > { %p1138_p8 = scmp.ne.s32.totalorder %s1726_s25, %s1167_s12  ;;  %p1139_p11 = pneg %p1730_p9 }
  0x97   : > { %s1142_s4 = scalar_lea.hbm %s1897_s2, 4608  ;;  %p1146_p7 = scmp.lt.u32.totalorder %s1167_s12, %s1726_s25 }
  0x98   : > { %p1140_p4 = pnand %p1139_p11, %p1138_p8  ;;  %p1144_p5 = scmp.lt.u32.totalorder %s1142_s4, %s1167_s12 }
  0x9a   : > { %p1141_p3 = pneg %p1140_p4  ;;  %p1145_p6 = por %p1144_p5, %p1143_p10 }
  0x9c   : > { %p1147_p2 = por %p1146_p7, %p1145_p6 }
  0x9e   : > { %p1148_p1 = pnand %p1147_p2, %p1141_p3 }
  0xa0   : > { %1151 = shalt.err (!%p1148_p1)
}
  0xa1   : > { %s1152_s6 = scalar_lea.vmem %s318_s9, 128  ;;  %s1358_s8 = smov [#allocation11]  }
  0xa2   : > { %p1153_p0 = scmp.ne.s32.totalorder %s318_s9, %s1152_s6  ;;  %s1157_s21 = sshll.u32 %s1358_s8, 4  ;;  %s1158_s21 = int_to_ptr.vmem [resolvable:$false] %s1157_s21 }
  0xa3   : > { %s1159_s15 = scalar_lea.vmem %s1158_s21, 256  ;;  %p1160_p4 = scmp.lt.s32.totalorder %s318_s9, %s1158_s21 }
  0xa4   : > { %p1155_p13 = pnand %p1153_p0, %p1139_p11  ;;  %p1161_p12 = scmp.lt.s32.totalorder %s1159_s15, %s1152_s6 }
  0xa6   : > { %p1156_p8 = pneg %p1155_p13  ;;  %p1162_p5 = por %p1161_p12, %p1160_p4 }
  0xa8   : > { %p1163_p10 = pnand %p1162_p5, %p1156_p8 }
  0xaa   : > { %1166 = shalt.err (!%p1163_p10)
}
  0xab   : > { %910 = dma.hbm_to_vmem [thread:$0]  (!%p1730_p9), %s1726_s25, 128, %s318_s9, %s1595_s16  }
  0xac   : > { %p1963_p3 = scmp.ne.s32.totalorder %s1943_s13, 0 }
  0xad   : > { %s1759_s12 = sand.u32 (!%p1963_p3), 1, %s1314_s19   ;;  %p1964_p12 = scmp.ne.s32.totalorder (!%p1963_p3), %s1949_s5, 0 }
  0xae   : > { %326 = sbr.rel (%p1963_p3) target bundleno = 1136 (0x470), region = 32  ;;  %s849_s1 = sshll.u32 (!%p1963_p3), %s1759_s12, 3 }
  0xaf   : > { %s329_s24 = scalar_lea.sflag (!%p1963_p3), [#allocation7], %s1759_s12  ;;  %s332_s4 = scalar_lea.vmem (!%p1963_p3), [#allocation6], %s849_s1 }
  0xb5   : > { %1269 = dma.done.wait (%p1964_p12), %s329_s24, 128  }
  0xb6   : > { %1271 = vsyncadd (%p1964_p12), %s329_s24, 4294967168  ;;  %s1965_s17 = sld [smem:[#allocation20_spill]]  ;;  %s337_s16 = sand.u32 1, %s1477_s30  }
  0xb7   : > { %s338_s9 = scalar_lea.sflag [#allocation10], %s337_s16  ;;  %p1966_p9 = scmp.ne.s32.totalorder %s1937_s3, 0 }
  0xbc   : > { %s339_s13 = sand.u32 1, %s1965_s17  }
  0xbd   : > { %s1769_s25 = sshll.u32 %s339_s13, 3 }
  0xbe   : > { %s341_s7 = scalar_lea.vmem [#allocation9], %s1769_s25 }
  0xbf   : > { %1273 = dma.done.wait (%p1966_p9), %s338_s9, 128  }
  0xc0   : > { %1275 = vsyncadd (%p1966_p9), %s338_s9, 4294967168  ;;  %s1967_s11 = sld [smem:[#allocation18_spill]]  ;;  %p1968_p11 = scmp.ne.s32.totalorder %s1960_s23, 0 }
  0xc6   : > { %s348_s6 = sand.u32 1, %s1967_s11  }
  0xc7   : > { %s1777_s5 = sshll.u32 %s348_s6, 3 }
  0xc8   : > { %s350_s8 = scalar_lea.vmem [#allocation11], %s1777_s5 }
  0xc9   : > { %1277 = dma.done.wait (%p1968_p11), %s338_s9, 128  }
  0xca   : > { %1279 = vsyncadd (%p1968_p11), %s338_s9, 4294967168  ;;  %s1784_s30 = scalar_lea.vmem [#allocation12], %s849_s1  ;;  %s1969_s21 = sld [smem:[#allocation22_spill]] }
  0xd0   : > { %p853_p6 = scmp.ne.s32.totalorder %s1969_s21, 0 }
  0xd1   : > { %vm411_vm0 = vcmask (!%p853_p6), 7168   ;;  %v415_v0 = vld [vmem:[%s332_s4] sm:$0xff] (!%p853_p6)  ;;  %v1359_v1 = vmov (!%p853_p6), -inf   ;;  %v1360_v2 = vmov (!%p853_p6), 0.0  }
  0xd2   : > { %410 = sbr.rel (%p853_p6) target bundleno = 217 (0xd9), region = 48  ;;  %412 = vst.msk [vmem:[#allocation2] sm:$0xff] (!%p853_p6), %vm411_vm0, %v1359_v1  ;;  %413 = vst.msk [vmem:[#allocation3] sm:$0xff] (!%p853_p6), %vm411_vm0, %v1360_v2  ;;  %v416_v3 = vmul.f32 (!%p853_p6), 0.088388346, %v415_v0 }
  0xd3   : > { %414 = vst [vmem:[#allocation4] sm:$0xff] (!%p853_p6), %v1360_v2 }
  0xd4   : > { %417 = vst [vmem:[#allocation5] sm:$0xff] (!%p853_p6), %v416_v3 }
  0xd9 PF: > { %s1970_s3 = sld [smem:[#allocation23_spill]]  ;;  %s1971_s15 = sld [smem:[#allocation22_spill]] }
  0xdf   : > { %s854_s24 = sshll.u32 %s1970_s3, 3  ;;  %s1789_s23 = sshll.u32 %s1971_s15, 3 }
  0xe0   : > { %s420_s1 = sadd.s32 8, %s854_s24  ;;  %s422_s17 = sadd.s32 8, %s1789_s23 }
  0xe1   : > { %p421_p7 = scmp.le.s32.totalorder %s420_s1, 9  ;;  %p423_p2 = scmp.le.s32.totalorder %s422_s17, 9 }
  0xe2   : > { %p426_p1 = scmp.ge.s32.totalorder %s854_s24, 9  ;;  %p427_p0 = scmp.ge.s32.totalorder %s1789_s23, 9 }
  0xe3   : > { %p424_p13 = pnand %p423_p2, %p421_p7 }
  0xe4   : > { %p428_p8 = pnand %p427_p0, %p426_p1 }
  0xe5   : > { %p425_p4 = pneg %p424_p13 }
  0xe6   : > { %p429_p5 = pneg %p428_p8 }
  0xe8   : > { %p430_p10 = por %p429_p5, %p425_p4 }
  0xe9   : > { %v434_v4 = vld [vmem:[%s341_s7] sm:$0xff] (!%p430_p10)  ;;  %v1361_v5 = vmov (!%p430_p10), 0.0   ;;  %vm1362_vm1 = vmmov (!%p430_p10), 0   ;;  %v436_v7 = vlaneseq (!%p430_p10)  ;;  %v438_v10 = vstv (!%p430_p10), %s854_s24  ;;  %v532_v19 = vld [vmem:[#allocation2] sm:$0xff] (!%p430_p10)  ;;  %v549_v32 = vld [vmem:[#allocation3] sm:$0xff] (!%p430_p10) }
  0xea   : > { %433 = sbr.rel (%p430_p10) target bundleno = 954 (0x3ba), region = 52  ;;  %880 = vmatprep.subr.mxu0 (!%p430_p10), %v1361_v5  ;;  %882 = vmatprep.mubr.msk.f32.mxu0 (!%p430_p10), %vm1362_vm1, %v1361_v5  ;;  %v460_v6 = vld [vmem:[#allocation5] sm:$0xff] (!%p430_p10)  ;;  %v442_v11 = vstv (!%p430_p10), %s1789_s23  ;;  %vm533_vm7 = vcmask (!%p430_p10), 64512   ;;  %v1363_v18 = vmov (!%p430_p10), 0   ;;  %vm555_vm8 = vcmask (!%p430_p10), 7168   ;;  %v435_v23 = vld [vmem:[%s350_s8] sm:$0xff] (!%p430_p10) }
  0xeb   : > { %881 = vmatpush3.xpose.msra.mxu0 (!%p430_p10), %v434_v4  ;;  %885 = vmatprep.subr.mxu1 (!%p430_p10), %v1361_v5  ;;  %v437_v8 = vshrl.u32 (!%p430_p10), %v436_v7, 7  ;;  %v441_v9 = vand.u32 (!%p430_p10), 127, %v436_v7  ;;  %v630_v36 = vld [vmem:[#allocation4] sm:$0xff] (!%p430_p10) }
  0xec   : > { %887 = vmatprep.mubr.msk.f32.mxu1 (!%p430_p10), %vm1362_vm1, %v1361_v5  ;;  %1067 = vset.pattern.permute.xlu0 (!%p430_p10), %v1363_v18 }
  0xed   : > { %v439_v12 = vadd.s32 (!%p430_p10), %v438_v10, %v437_v8  ;;  %v443_v13 = vadd.s32 (!%p430_p10), %v442_v11, %v441_v9  ;;  %1068 = vset.pattern.permute.xlu1 (!%p430_p10), %v1363_v18  ;;  %v455_v24 = vadd.s32 (!%p430_p10), %v442_v11, %v437_v8 }
  0xee   : > { %883 = vmatmul.mubr.f32.vlgmr.msra.gmra.mrb[0].mxu0 (!%p430_p10), %v460_v6 }
  0xef   : > { %vm444_vm2 = vcmp.lt.s32.totalorder (!%p430_p10), %v439_v12, 9  ;;  %vm445_vm3 = vcmp.lt.s32.totalorder (!%p430_p10), %v443_v13, 9  ;;  %vm451_vm5 = vcmp.lt.s32.totalorder (!%p430_p10), %v443_v13, 20  ;;  %vm456_vm9 = vcmp.lt.s32.totalorder (!%p430_p10), %v455_v24, 20 }
  0xf0   : > { %vm450_vm4 = vmxor (!%p430_p10), %vm444_vm2, %vm445_vm3  ;;  %886 = vmatpush3.msk.msra.mxu1 (!%p430_p10), %vm456_vm9, %v435_v23 }
  0xf1   : > { %vm454_vm6 = vmand %vm450_vm4, %vm451_vm5 }
 0x1c1   : > { %v527_v14 = vpop.f32.mrb[0].mxu0 }
 0x1c2   : > { %v531_v15 = vsel %vm454_vm6, %v527_v14, -1e+30  ;;  %v884_v16 = vpop.f32.mrb[1].mxu0 }
 0x1c3   : > { %v534_v17 = vsel %vm533_vm7, %v531_v15, -inf }
 0x1c4   : > { %535 = vmax.xlane.f32.xlu0 %v534_v17 }
 0x251   : > { %v536_v20 = vpop.xlane.xlu0 %535 }
 0x252   : > { %v537_v21 = vmax.f32 %v532_v19, %v536_v20 }
 0x254   : > { %v538_v22 = vsub.f32 %v532_v19, %v537_v21  ;;  %639 = vst.msk [vmem:[#allocation2] sm:$0xff] %vm555_vm8, %v537_v21  ;;  %543 = vperm.xlu0 %1067, %v537_v21  }
 0x256   : > { %v539_v30 = vmul.f32 1.442695, %v538_v22 }
 0x2d3   : > { %v544_v25 = vpop.permute.xlu0 %543 }
 0x2d4   : > { %v546_v26 = vsub.f32 %v531_v15, %v544_v25 }
 0x2d6   : > { %v547_v27 = vmul.f32 1.442695, %v546_v26 }
 0x2d8   : > { %1069 = vpow2.f32 %v547_v27 }
 0x2d9   : > { %1071 = vpow2.f32 %v539_v30 }
 0x2e2   : > { %v1070_v28 = vpop.eup %1069 }
 0x2e3   : > { %888 = vmatmul.mubr.msk.f32.vlgmr.msra.gmra.mrb[0].mxu1 %vm533_vm7, %v1070_v28  ;;  %v551_v29 = vsel %vm533_vm7, %v1070_v28, 0.0  ;;  %v1072_v31 = vpop.eup %1071 }
 0x2e4   : > { %552 = vadd.xlane.f32.xlu1 %v551_v29  ;;  %v550_v33 = vmul.f32 %v1072_v31, %v549_v32 }
 0x2f5   : > { %633 = vperm.xlu1 %1068, %v1072_v31  }
 0x371   : > { %v553_v34 = vpop.xlane.xlu1 %552 }
 0x372   : > { %v554_v35 = vadd.f32 %v553_v34, %v550_v33 }
 0x374   : > { %556 = vst.msk [vmem:[#allocation3] sm:$0xff] %vm555_vm8, %v554_v35 }
 0x375   : > { %v634_v37 = vpop.permute.xlu1 %633 }
 0x376   : > { %v636_v38 = vmul.f32 %v634_v37, %v630_v36 }
 0x3b6   : > { %v626_v39 = vpop.f32.mrb[0].mxu1 }
 0x3b7   : > { %v637_v40 = vadd.f32 %v636_v38, %v626_v39  ;;  %v889_v41 = vpop.f32.mrb[1].mxu1 }
 0x3b9   : > { %638 = vst [vmem:[#allocation4] sm:$0xff] %v637_v40 }
 0x3ba PF: > { %s1972_s4 = sld [smem:[#allocation22_spill]] }
 0x3c0   : > { %p858_p3 = scmp.ne.s32.totalorder %s1972_s4, 2 }
 0x3c1   : > { %v645_v42 = vld [vmem:[#allocation3] sm:$0xff] (!%p858_p3)  ;;  %v1364_v43 = vmov (!%p858_p3), 0   ;;  %v644_v45 = vld [vmem:[#allocation4] sm:$0xff] (!%p858_p3) }
 0x3c2   : > { %643 = sbr.rel (%p858_p3) target bundleno = 1105 (0x451), region = 56  ;;  %1073 = vset.pattern.permute.xlu0 (!%p858_p3), %v1364_v43 }
 0x3c3   : > { %648 = vperm.xlu0 (!%p858_p3), %1073, %v645_v42  }
 0x442   : > { %v649_v44 = vpop.permute.xlu0 %648 }
 0x443   : > { %1074 = vrcp.f32 %v649_v44 }
 0x44d   : > { %v1075_v46 = vpop.eup %1074 }
 0x44e   : > { %v652_v47 = vmul.f32 %v1075_v46, %v644_v45 }
 0x450   : > { %653 = vst [vmem:[%s1784_s30] sm:$0xff] %v652_v47 }
 0x451 PF: > { %s1973_s16 = sld [smem:[#allocation23_spill]]  ;;  %s1974_s13 = sld [smem:[#allocation24_spill]] }
 0x452   : > { %s1975_s25 = sld [smem:[#allocation25_spill]]  ;;  %s672_s6 = sshll.u32 %s1784_s30, 4  ;;  %s1809_s6 = int_to_ptr.vmem [resolvable:$true] %s672_s6 }
 0x453   : > { %s1976_s15 = sld [smem:[#allocation35_spill]]  ;;  %s655_s23 = scalar_lea.sflag [#allocation8], %s1759_s12 }
 0x454   : > { %s1168_s17 = scalar_lea.vmem %s1809_s6, 128  ;;  %p1978_p9 = scmp.ne.s32.totalorder %s1950_s14, 0 }
 0x455   : > { %p1169_p12 = scmp.ne.s32.totalorder %s1809_s6, %s1168_s17  ;;  %s1365_s4 = smov [#allocation12]  }
 0x457   : > { %s860_s9 = sshll.u32 %s1973_s16, 1  ;;  %p1170_p11 = pnand %p1169_p12, %p1978_p9 }
 0x458   : > { %s666_s7 = sadd.s32 %s1974_s13, %s860_s9  ;;  %s892_s11 = smul.u32 6, %s1975_s25 }
 0x459   : > { %s1977_s1 = smov %s1976_s15  ;;  %p1171_p6 = pneg %p1170_p11 }
 0x45a   : > { %s668_s5 = sadd.s32 %s892_s11, %s666_s7  ;;  %s1172_s16 = sshll.u32 %s1365_s4, 4  ;;  %s1173_s16 = int_to_ptr.vmem [resolvable:$false] %s1172_s16 }
 0x45b   : > { %s861_s8 = sshll.u32 %s668_s5, 7  ;;  %s1174_s30 = scalar_lea.vmem %s1173_s16, 256 }
 0x45c   : > { %s670_s24 = scalar_lea.hbm %s1976_s15, %s861_s8  ;;  %p1175_p7 = scmp.lt.s32.totalorder %s1809_s6, %s1173_s16 }
 0x45d   : > { %p1176_p2 = scmp.lt.s32.totalorder %s1174_s30, %s1168_s17 }
 0x45f   : > { %p1177_p1 = por %p1176_p2, %p1175_p7 }
 0x461   : > { %p1178_p0 = pnand %p1177_p1, %p1171_p6 }
 0x463   : > { %1181 = shalt.err (!%p1178_p0)
}
 0x464   : > { %s1182_s13 = scalar_lea.hbm %s670_s24, 128  ;;  %s1186_s9 = scalar_lea.hbm %s1977_s1, 1536 }
 0x465   : > { %p1183_p13 = scmp.ne.s32.totalorder %s670_s24, %s1182_s13  ;;  %p1187_p5 = scmp.lt.u32.totalorder %s670_s24, %s1977_s1 }
 0x466   : > { %p1188_p10 = scmp.lt.u32.totalorder %s1186_s9, %s1182_s13  ;;  %p1190_p12 = scmp.lt.u32.totalorder %s1182_s13, %s670_s24 }
 0x467   : > { %p1184_p8 = pnand %p1183_p13, %p1978_p9 }
 0x468   : > { %p1189_p3 = por %p1188_p10, %p1187_p5 }
 0x469   : > { %p1185_p4 = pneg %p1184_p8 }
 0x46a   : > { %p1191_p11 = por %p1190_p12, %p1189_p3 }
 0x46c   : > { %p1192_p6 = pnand %p1191_p11, %p1185_p4 }
 0x46e   : > { %1195 = shalt.err (!%p1192_p6)
}
 0x46f   : > { %899 = dma.vmem_to_hbm [thread:$0]  (%p1978_p9), %s1809_s6, 128, %s670_s24, %s655_s23  }
 0x470 PF: > { %p916_p7 = scmp.ge.s32.totalorder %s1354_s29, 2  ;;  %s684_s5 = sand.u32 1, %s1310_s18  }
 0x471   : > { %p1979_p2 = scmp.ne.s32.totalorder %s1951_s10, 0  ;;  %s685_s8 = scalar_lea.sflag [#allocation8], %s684_s5 }
 0x473   : > { %p912_p1 = pnand %p916_p7, %p1979_p2 }
 0x475   : > { %1281 = dma.done.wait (!%p912_p1), %s685_s8, 128  }
 0x476   : > { %1283 = vsyncadd (!%p912_p1), %s685_s8, 4294967168  ;;  %s22_s29 = sadd.s32 1, %s1354_s29   ;;  %s1981_s12 = sld [smem:[#allocation18_spill]] }
 0x477   : > { %p1836_p0 = scmp.ge.s32.totalorder %s22_s29, 38   ;;  %s1982_s13 = sld [smem:[#allocation19_spill]] }
 0x478   : > { %s1983_s15 = sld [smem:[#allocation20_spill]]  ;;  %s1984_s16 = sld [smem:[#allocation21_spill]] }
 0x479   : > { %s1985_s17 = sld [smem:[#allocation31_spill]]  ;;  %s1986_s6 = sld [smem:[#allocation32_spill]] }
 0x47a   : > { %s1987_s10 = sld [smem:[#allocation26_spill]]  ;;  %s1988_s25 = sld [smem:[#allocation27_spill]] }
 0x47b   : > { %s1989_s3 = sld [smem:[#allocation28_spill]]  ;;  %s1990_s4 = sld [smem:[#allocation29_spill]] }
 0x47c   : > { %s1991_s30 = sld [smem:[#allocation30_spill]]  ;;  %s1992_s14 = smov %s1710_s22 }
 0x47d   : > { %s1994_s18 = smov %s1314_s19  ;;  %s1995_s19 = smov %s1318_s20 }
 0x47e   : > { %s1998_s22 = smov %s1342_s26  ;;  %s1999_s23 = smov %s1346_s27 }
 0x47f   : > { %s1996_s20 = smov %s1986_s6  ;;  %s2000_s24 = smov %s1350_s28 }
 0x480   : > { %s1997_s21 = smov %s1987_s10  ;;  %21 = sbr.rel (!%p1836_p0) target bundleno = 18 (0x12), region = 113 }
 0x481   : > { %s2001_s26 = smov %s1989_s3  ;;  %s2002_s27 = smov %s1990_s4 }
 0x482   : > { %s2003_s28 = smov %s1991_s30 }
 0x487   :  { %690 = vsyncpa [#allocation7], 1 }
 0x488   :  { %692 = vsyncpa [#allocation7 + $0x1], 1 }
 0x489   :  { %693 = vsyncpa [#allocation10], 1 }
 0x48a   :  { %695 = vsyncpa [#allocation10 + $0x1], 1 }
 0x48b   :  { %696 = vsyncpa [#allocation8], 1 }
 0x48c   :  { %698 = vsyncpa [#allocation8 + $0x1], 1 }

// kernel: masking_attention_forward.5
= control target key start
LH: loop header
LB: loop body
LE: loop exit
PB: predicated region body
PF: predicated region fallthrough
CT: control target
= control target key end

     0   :  { %8 = vsyncpa [#allocation3], 0  ;;  %s1243_s0 = inlined_call_operand.hbm [shape: f32[2,20,256], index: 0, kind: input, shape index: {}]   ;;  %s1244_s1 = inlined_call_operand.hbm [shape: f32[256,256], index: 1, kind: input, shape index: {}]   ;;  %s1245_s2 = inlined_call_operand.hbm [shape: f32[1,256], index: 2, kind: input, shape index: {}]   ;;  %s1246_s3 = inlined_call_operand.hbm [shape: f32[2,20,256], index: 3, kind: output, shape index: {}]  }
   0x1   :  { %10 = vsyncpa [#allocation3 + $0x1], 0 }
   0x2   :  { %11 = vsyncpa [#allocation6], 0 }
   0x3   :  { %12 = vsyncpa [#allocation4], 0 }
   0x4   :  { %14 = vsyncpa [#allocation4 + $0x1], 0  ;;  %s972_s12 = smov 0   ;;  %s974_s13 = smov 0  }
   0x5   :  { %s976_s14 = smov 0   ;;  %s978_s15 = smov 0  }
   0x6   :  { %s980_s16 = smov 0   ;;  %s982_s17 = smov 0  }
   0x7 LB: > { %s570_s18 = sadd.s32 4294967295, %s942_s17   ;;  %s571_s19 = sadd.s32 4294967294, %s942_s17   ;;  %s942_s17 = sphi %s982_s17, %s20_s17   ;;  %s938_s16 = sphi %s980_s16, %s1268_s16   ;;  %s934_s15 = sphi %s978_s15, %s1267_s15   ;;  %s930_s14 = sphi %s976_s14, %s1266_s14   ;;  %s926_s13 = sphi %s974_s13, %s1265_s13   ;;  %s922_s12 = sphi %s972_s12, %s1264_s12  }
   0x8   : > { %p61_p0 = scmp.ne.s32.totalorder %s926_s13, %s922_s12  ;;  %p1006_p1 = scmp.eq.s32.totalorder %s570_s18, 0 }
   0x9   : > { %p1010_p2 = scmp.eq.s32.totalorder %s570_s18, 1  ;;  %p147_p3 = scmp.eq.s32.totalorder %s571_s19, 1 }
   0xa   : > { %s1251_s20 = scalar_select %p1006_p1, 1, 0 }
   0xb   : > { %p1016_p4 = por %p1006_p1, %p61_p0  ;;  %p572_p5 = scmp.ge.s32.totalorder %s942_s17, 1 }
   0xc   : > { %p1021_p6 = por %p147_p3, %p61_p0  ;;  %p154_p7 = scmp.lt.s32.totalorder %s942_s17, 3 }
   0xd   : > { %s1253_s22 = scalar_select %p1016_p4, 1, 0 }
   0xe   : > { %s1254_s23 = scalar_select %p1021_p6, 1, 0 }
   0xf   : > { %p1026_p8 = pnand %p572_p5, %p154_p7  ;;  %s944_s25 = smov [#allocation5]  }
  0x10   : > { %s169_s26 = sshll.u32 %s944_s25, 4  ;;  %s945_s28 = smov [#allocation7]   ;;  %s1030_s26 = int_to_ptr.vmem [resolvable:$true] %s169_s26 }
  0x11   : > { %p695_p9 = pneg %p1026_p8  ;;  %s186_s29 = sshll.u32 %s945_s28, 4  ;;  %s1041_s29 = int_to_ptr.vmem [resolvable:$true] %s186_s29 }
  0x12   : > { %s770_s5 = scalar_lea.hbm %s1244_s1, 8192 }
  0x13   : > { %p1037_p11 = pnand %p695_p9, %p1006_p1  ;;  %p771_p12 = scmp.ne.s32.totalorder %s1244_s1, %s770_s5 }
  0x14   : > { %p777_p5 = scmp.lt.u32.totalorder %s770_s5, %s1244_s1 }
  0x15   : > { %p772_p13 = pneg %p1037_p11 }
  0x17   : > { %p773_p0 = pnand %p772_p13, %p771_p12 }
  0x19   : > { %p774_p3 = pneg %p773_p0 }
  0x1b   : > { %p779_p7 = pnand %p777_p5, %p774_p3 }
  0x1d   : > { %782 = shalt.err (!%p779_p7)
}
  0x1e   : > { %s783_s10 = scalar_lea.vmem %s1030_s26, 8192  ;;  %p791_p1 = scmp.lt.s32.totalorder %s1030_s26, %s1030_s26 }
  0x1f   : > { %p784_p9 = scmp.ne.s32.totalorder %s1030_s26, %s783_s10  ;;  %p792_p12 = scmp.lt.s32.totalorder %s783_s10, %s783_s10 }
  0x21   : > { %p786_p10 = pnand %p784_p9, %p772_p13  ;;  %p793_p0 = por %p792_p12, %p791_p1 }
  0x23   : > { %p787_p6 = pneg %p786_p10 }
  0x25   : > { %p794_p4 = pnand %p793_p0, %p787_p6 }
  0x27   : > { %797 = shalt.err (!%p794_p4)
}
  0x28   : > { %s946_s11 = smov 256   ;;  %s947_s18 = smov 16  }
  0x29   : > { %698 = dma.hbm_to_vmem [thread:$0]  (!%p1037_p11), %s1244_s1, 8192, %s1030_s26, [#allocation6], %s946_s11, %s946_s11, %s947_s18  }
  0x2a   : > { %s798_s4 = scalar_lea.hbm %s1245_s2, 32 }
  0x2b   : > { %p799_p1 = scmp.ne.s32.totalorder %s1245_s2, %s798_s4  ;;  %p805_p10 = scmp.lt.u32.totalorder %s798_s4, %s1245_s2 }
  0x2d   : > { %p801_p4 = pnand %p799_p1, %p772_p13 }
  0x2f   : > { %p802_p6 = pneg %p801_p4 }
  0x31   : > { %p807_p3 = pnand %p805_p10, %p802_p6 }
  0x33   : > { %810 = shalt.err (!%p807_p3)
}
  0x34   : > { %s811_s26 = scalar_lea.vmem %s1041_s29, 32  ;;  %p819_p12 = scmp.lt.s32.totalorder %s1041_s29, %s1041_s29 }
  0x35   : > { %p812_p5 = scmp.ne.s32.totalorder %s1041_s29, %s811_s26  ;;  %p820_p0 = scmp.lt.s32.totalorder %s811_s26, %s811_s26 }
  0x37   : > { %p814_p7 = pnand %p812_p5, %p772_p13  ;;  %p821_p1 = por %p820_p0, %p819_p12 }
  0x39   : > { %p815_p9 = pneg %p814_p7 }
  0x3b   : > { %p822_p4 = pnand %p821_p1, %p815_p9 }
  0x3d   : > { %825 = shalt.err (!%p822_p4)
}
  0x3e   : > { %701 = dma.hbm_to_vmem [thread:$0]  (!%p1037_p11), %s1245_s2, 32, %s1041_s29, [#allocation6]  }
  0x3f   : > { %s39_s19 = sadd.s32 1, %s938_s16  ;;  %s48_s25 = sadd.s32 1, %s930_s14 }
  0x40   : > { %p41_p13 = scmp.ge.s32.totalorder %s39_s19, 2  ;;  %p55_p6 = scmp.ne.s32.totalorder %s930_s14, %s926_s13 }
  0x41   : > { %p56_p10 = scmp.eq.s32.totalorder %s942_s17, 0  ;;  %p712_p3 = scmp.lt.s32.totalorder %s942_s17, 2 }
  0x42   : > { %s1270_s19 = smov (%p41_p13, %s39_s19), 0  ;;  %p1108_p7 = por %p1010_p2, %p55_p6 }
  0x43   : > { %p57_p5 = por %p56_p10, %p55_p6  ;;  %s43_s28 = ssub.s32 %s938_s16, %s1270_s19 }
  0x44   : > { %s1257_s27 = scalar_select %p1108_p7, 1, 0 }
  0x45   : > { %s197_s30 = sand.u32 1, %s930_s14   ;;  %p46_p9 = scmp.eq.s32.totalorder %s43_s28, 0 }
  0x46   : > { %s679_s29 = smul.u32 48, %s197_s30  ;;  %p1115_p11 = pnand %p712_p3, %p57_p5 }
  0x47   : > { %s1120_s5 = scalar_select %p46_p9, %s930_s14, %s48_s25  }
  0x48   : > { %s680_s6 = smul.u32 768, %s938_s16  ;;  %s201_s7 = scalar_lea.vmem [#allocation2], %s679_s29 }
  0x49   : > { %s211_s8 = sshll.u32 %s201_s7, 4  ;;  %s1130_s10 = scalar_lea.sflag [#allocation3], %s197_s30  ;;  %s1128_s8 = int_to_ptr.vmem [resolvable:$true] %s211_s8 }
  0x4a   : > { %s1126_s9 = scalar_lea.hbm %s1243_s0, %s680_s6  ;;  %p828_p12 = pneg %p1115_p11 }
  0x4b   : > { %s826_s28 = scalar_lea.hbm %s1126_s9, 768  ;;  %s831_s6 = scalar_lea.hbm %s1243_s0, 1536 }
  0x4c   : > { %p827_p2 = scmp.ne.s32.totalorder %s1126_s9, %s826_s28  ;;  %p832_p4 = scmp.lt.u32.totalorder %s1126_s9, %s1243_s0 }
  0x4d   : > { %p833_p13 = scmp.lt.u32.totalorder %s831_s6, %s826_s28  ;;  %p835_p10 = scmp.lt.u32.totalorder %s826_s28, %s1126_s9 }
  0x4e   : > { %p829_p0 = pnand %p828_p12, %p827_p2 }
  0x4f   : > { %p834_p6 = por %p833_p13, %p832_p4 }
  0x50   : > { %p830_p1 = pneg %p829_p0 }
  0x51   : > { %p836_p3 = por %p835_p10, %p834_p6 }
  0x53   : > { %p837_p5 = pnand %p836_p3, %p830_p1 }
  0x55   : > { %840 = shalt.err (!%p837_p5)
}
  0x56   : > { %s841_s30 = scalar_lea.vmem %s1128_s8, 768  ;;  %s948_s26 = smov [#allocation2]  }
  0x57   : > { %p842_p9 = scmp.ne.s32.totalorder %s1128_s8, %s841_s30  ;;  %s846_s25 = sshll.u32 %s948_s26, 4  ;;  %s847_s25 = int_to_ptr.vmem [resolvable:$false] %s846_s25 }
  0x58   : > { %s848_s29 = scalar_lea.vmem %s847_s25, 1536  ;;  %p849_p7 = scmp.lt.s32.totalorder %s1128_s8, %s847_s25 }
  0x59   : > { %p844_p2 = pnand %p842_p9, %p828_p12  ;;  %p850_p4 = scmp.lt.s32.totalorder %s848_s29, %s841_s30 }
  0x5b   : > { %p845_p0 = pneg %p844_p2  ;;  %p851_p13 = por %p850_p4, %p849_p7 }
  0x5d   : > { %p852_p6 = pnand %p851_p13, %p845_p0 }
  0x5f   : > { %855 = shalt.err (!%p852_p6)
}
  0x60   : > { %705 = dma.hbm_to_vmem [thread:$0]  (!%p1115_p11), %s1126_s9, 768, %s1128_s8, %s1130_s10, %s946_s11, %s946_s11, %s947_s18  }
  0x61   : > { %223 = sbr.rel (%p1026_p8) target bundleno = 409 (0x199), region = 32  ;;  %s1164_s28 = sand.u32 (!%p1026_p8), 1, %s926_s13  }
  0x62   : > { %s681_s6 = smul.u32 (!%p1026_p8), 48, %s1164_s28  ;;  %s226_s7 = scalar_lea.sflag (!%p1026_p8), [#allocation3], %s1164_s28 }
  0x63   : > { %p1259_p7 = scmp.ne.s32.totalorder (!%p1026_p8), %s1253_s22, 0 }
  0x64   : > { %s1170_s4 = scalar_lea.vmem (!%p1026_p8), [#allocation2], %s681_s6 }
  0x68   : > { %909 = dma.done.wait (%p1259_p7), %s226_s7, 768  }
  0x69   : > { %911 = vsyncadd (%p1259_p7), %s226_s7, 4294966528  ;;  %p1260_p11 = scmp.ne.s32.totalorder %s1251_s20, 0 }
  0x6b   : > { %913 = dma.done.wait (%p1260_p11), [#allocation6], 8224  }
  0x6c   : > { %915 = vsyncadd (%p1260_p11), [#allocation6], 4294959072  ;;  %v272_v0 = vld [vmem:[#allocation5 + $0x8] sm:$0xff]  ;;  %v274_v1 = vld [vmem:[#allocation5 + $0x18] sm:$0xff]  ;;  %s259_s20 = scalar_lea.vmem [#allocation8], %s681_s6  ;;  %s682_s24 = smul.u32 768, %s934_s15 }
  0x6d   : > { %v271_v2 = vld [vmem:[#allocation5] sm:$0xff]  ;;  %v583_v3 = vpack.c.bf16 %v274_v1, %v272_v0  ;;  %v273_v4 = vld [vmem:[#allocation5 + $0x10] sm:$0xff]  ;;  %v276_v5 = vld [vmem:[#allocation5 + $0x28] sm:$0xff]  ;;  %s455_s22 = sshll.u32 %s259_s20, 4  ;;  %s437_s15 = scalar_lea.sflag [#allocation4], %s1164_s28  ;;  %s1189_s22 = int_to_ptr.vmem [resolvable:$true] %s455_s22 }
  0x6e   : > { %v278_v6 = vld [vmem:[#allocation5 + $0x38] sm:$0xff]  ;;  %v585_v7 = vpack.c.bf16 %v273_v4, %v271_v2  ;;  %v275_v9 = vld [vmem:[#allocation5 + $0x20] sm:$0xff]  ;;  %v277_v10 = vld [vmem:[#allocation5 + $0x30] sm:$0xff]  ;;  %s1194_s8 = scalar_lea.hbm %s1246_s3, %s682_s24  ;;  %s856_s9 = scalar_lea.vmem %s1189_s22, 768 }
  0x6f   : > { %v587_v8 = vpack.c.bf16 %v278_v6, %v276_v5  ;;  %v280_v11 = vld [vmem:[#allocation5 + $0x48] sm:$0xff]  ;;  %647 = vmatprep.subr.bf16.mxu1 %v583_v3  ;;  %584 = vmatprep.subr.bf16.mxu0 %v583_v3  ;;  %v282_v12 = vld [vmem:[#allocation5 + $0x58] sm:$0xff]  ;;  %v589_v13 = vpack.c.bf16 %v277_v10, %v275_v9  ;;  %v279_v15 = vld [vmem:[#allocation5 + $0x40] sm:$0xff]  ;;  %p857_p8 = scmp.ne.s32.totalorder %s1189_s22, %s856_s9  ;;  %p1261_p12 = scmp.ne.s32.totalorder %s1257_s27, 0 }
  0x70   : > { %663 = vmatpush1.bf16.msra.mxu1 %v585_v7  ;;  %586 = vmatpush1.bf16.msra.mxu0 %v585_v7  ;;  %v591_v14 = vpack.c.bf16 %v282_v12, %v280_v11  ;;  %v281_v16 = vld [vmem:[#allocation5 + $0x50] sm:$0xff]  ;;  %v284_v17 = vld [vmem:[#allocation5 + $0x68] sm:$0xff]  ;;  %v286_v18 = vld [vmem:[#allocation5 + $0x78] sm:$0xff]  ;;  %s949_s10 = smov [#allocation8]  }
  0x71   : > { %648 = vmatprep.subr.bf16.mxu1 %v587_v8  ;;  %588 = vmatprep.subr.bf16.mxu0 %v587_v8  ;;  %v593_v19 = vpack.c.bf16 %v281_v16, %v279_v15  ;;  %v595_v20 = vpack.c.bf16 %v286_v18, %v284_v17  ;;  %v283_v21 = vld [vmem:[#allocation5 + $0x60] sm:$0xff]  ;;  %v285_v22 = vld [vmem:[#allocation5 + $0x70] sm:$0xff]  ;;  %v288_v23 = vld [vmem:[#allocation5 + $0x88] sm:$0xff]  ;;  %p858_p1 = pnand %p857_p8, %p1261_p12  ;;  %s860_s21 = sshll.u32 %s949_s10, 4  ;;  %s861_s21 = int_to_ptr.vmem [resolvable:$false] %s860_s21 }
  0x72   : > { %v290_v24 = vld [vmem:[#allocation5 + $0x98] sm:$0xff]  ;;  %v597_v25 = vpack.c.bf16 %v285_v22, %v283_v21  ;;  %v287_v27 = vld [vmem:[#allocation5 + $0x80] sm:$0xff]  ;;  %v289_v28 = vld [vmem:[#allocation5 + $0x90] sm:$0xff]  ;;  %s862_s30 = scalar_lea.vmem %s861_s21, 1536  ;;  %p863_p3 = scmp.lt.s32.totalorder %s1189_s22, %s861_s21 }
  0x73   : > { %v599_v26 = vpack.c.bf16 %v290_v24, %v288_v23  ;;  %v292_v29 = vld [vmem:[#allocation5 + $0xa8] sm:$0xff]  ;;  %v294_v30 = vld [vmem:[#allocation5 + $0xb8] sm:$0xff]  ;;  %v601_v31 = vpack.c.bf16 %v289_v28, %v287_v27  ;;  %v291_v33 = vld [vmem:[#allocation5 + $0xa0] sm:$0xff]  ;;  %p859_p10 = pneg %p858_p1  ;;  %p864_p5 = scmp.lt.s32.totalorder %s862_s30, %s856_s9 }
  0x74   : > { %664 = vmatpush1.bf16.msra.mxu1 %v589_v13  ;;  %590 = vmatpush1.bf16.msra.mxu0 %v589_v13  ;;  %v603_v32 = vpack.c.bf16 %v294_v30, %v292_v29  ;;  %v293_v34 = vld [vmem:[#allocation5 + $0xb0] sm:$0xff]  ;;  %v296_v35 = vld [vmem:[#allocation5 + $0xc8] sm:$0xff]  ;;  %v298_v36 = vld [vmem:[#allocation5 + $0xd8] sm:$0xff] }
  0x75   : > { %649 = vmatprep.subr.bf16.mxu1 %v591_v14  ;;  %592 = vmatprep.subr.bf16.mxu0 %v591_v14  ;;  %v605_v37 = vpack.c.bf16 %v293_v34, %v291_v33  ;;  %v607_v38 = vpack.c.bf16 %v298_v36, %v296_v35  ;;  %v295_v39 = vld [vmem:[#allocation5 + $0xc0] sm:$0xff]  ;;  %v297_v40 = vld [vmem:[#allocation5 + $0xd0] sm:$0xff]  ;;  %v268_v41 = vld [vmem:[%s1170_s4 + $0x18] sm:$0xff]  ;;  %p865_p9 = por %p864_p5, %p863_p3 }
  0x76   : > { %v300_v42 = vld [vmem:[#allocation5 + $0xe8] sm:$0xff]  ;;  %v302_v43 = vld [vmem:[#allocation5 + $0xf8] sm:$0xff]  ;;  %417 = vmatprep.mubr.f32.mxu1 %v268_v41  ;;  %v609_v45 = vpack.c.bf16 %v297_v40, %v295_v39  ;;  %v299_v47 = vld [vmem:[#allocation5 + $0xe0] sm:$0xff] }
  0x77   : > { %v266_v44 = vld [vmem:[%s1170_s4 + $0x8] sm:$0xff]  ;;  %v611_v46 = vpack.c.bf16 %v302_v43, %v300_v42  ;;  %v301_v48 = vld [vmem:[#allocation5 + $0xf0] sm:$0xff]  ;;  %v303_v53 = vld [vmem:[#allocation5 + $0x100] sm:$0xff]  ;;  %p866_p2 = pnand %p865_p9, %p859_p10 }
  0x78   : > { %665 = vmatpush1.bf16.msra.mxu1 %v593_v19  ;;  %594 = vmatpush1.bf16.msra.mxu0 %v593_v19  ;;  %v304_v49 = vld [vmem:[#allocation5 + $0x108] sm:$0xff]  ;;  %v306_v50 = vld [vmem:[#allocation5 + $0x118] sm:$0xff]  ;;  %v613_v51 = vpack.c.bf16 %v301_v48, %v299_v47  ;;  %v305_v54 = vld [vmem:[#allocation5 + $0x110] sm:$0xff] }
  0x79   : > { %650 = vmatprep.subr.bf16.mxu1 %v595_v20  ;;  %596 = vmatprep.subr.bf16.mxu0 %v595_v20  ;;  %v615_v52 = vpack.c.bf16 %v306_v50, %v304_v49  ;;  %v308_v55 = vld [vmem:[#allocation5 + $0x128] sm:$0xff]  ;;  %v310_v56 = vld [vmem:[#allocation5 + $0x138] sm:$0xff]  ;;  %v617_v57 = vpack.c.bf16 %v305_v54, %v303_v53  ;;  %v307_v59 = vld [vmem:[#allocation5 + $0x120] sm:$0xff] }
  0x7a   : > { %411 = vmatprep.mubr.f32.mxu0 %v266_v44  ;;  %v619_v58 = vpack.c.bf16 %v310_v56, %v308_v55  ;;  %v309_v60 = vld [vmem:[#allocation5 + $0x130] sm:$0xff]  ;;  %v312_v61 = vld [vmem:[#allocation5 + $0x148] sm:$0xff]  ;;  %v314_v62 = vld [vmem:[#allocation5 + $0x158] sm:$0xff] }
  0x7b   : > { %v621_v63 = vpack.c.bf16 %v309_v60, %v307_v59  ;;  %v623_v0 = vpack.c.bf16 %v314_v62, %v312_v61  ;;  %v311_v1 = vld [vmem:[#allocation5 + $0x140] sm:$0xff]  ;;  %v313_v2 = vld [vmem:[#allocation5 + $0x150] sm:$0xff]  ;;  %v316_v3 = vld [vmem:[#allocation5 + $0x168] sm:$0xff] }
  0x7c   : > { %666 = vmatpush1.bf16.msra.mxu1 %v597_v25  ;;  %598 = vmatpush1.bf16.msra.mxu0 %v597_v25  ;;  %v318_v4 = vld [vmem:[#allocation5 + $0x178] sm:$0xff]  ;;  %v625_v5 = vpack.c.bf16 %v313_v2, %v311_v1  ;;  %v315_v7 = vld [vmem:[#allocation5 + $0x160] sm:$0xff]  ;;  %v317_v8 = vld [vmem:[#allocation5 + $0x170] sm:$0xff] }
  0x7d   : > { %651 = vmatprep.subr.bf16.mxu1 %v599_v26  ;;  %600 = vmatprep.subr.bf16.mxu0 %v599_v26  ;;  %v627_v6 = vpack.c.bf16 %v318_v4, %v316_v3  ;;  %v320_v9 = vld [vmem:[#allocation5 + $0x188] sm:$0xff]  ;;  %v322_v10 = vld [vmem:[#allocation5 + $0x198] sm:$0xff]  ;;  %v629_v11 = vpack.c.bf16 %v317_v8, %v315_v7  ;;  %v319_v13 = vld [vmem:[#allocation5 + $0x180] sm:$0xff] }
  0x7e   : > { %v631_v12 = vpack.c.bf16 %v322_v10, %v320_v9  ;;  %v321_v14 = vld [vmem:[#allocation5 + $0x190] sm:$0xff]  ;;  %v324_v15 = vld [vmem:[#allocation5 + $0x1a8] sm:$0xff]  ;;  %v326_v16 = vld [vmem:[#allocation5 + $0x1b8] sm:$0xff] }
  0x7f   : > { %v633_v17 = vpack.c.bf16 %v321_v14, %v319_v13  ;;  %v635_v18 = vpack.c.bf16 %v326_v16, %v324_v15  ;;  %v323_v19 = vld [vmem:[#allocation5 + $0x1a0] sm:$0xff]  ;;  %v325_v20 = vld [vmem:[#allocation5 + $0x1b0] sm:$0xff]  ;;  %v328_v21 = vld [vmem:[#allocation5 + $0x1c8] sm:$0xff] }
  0x80   : > { %667 = vmatpush1.bf16.msra.mxu1 %v601_v31  ;;  %602 = vmatpush1.bf16.msra.mxu0 %v601_v31  ;;  %v330_v22 = vld [vmem:[#allocation5 + $0x1d8] sm:$0xff]  ;;  %v637_v23 = vpack.c.bf16 %v325_v20, %v323_v19  ;;  %v327_v25 = vld [vmem:[#allocation5 + $0x1c0] sm:$0xff]  ;;  %v329_v26 = vld [vmem:[#allocation5 + $0x1d0] sm:$0xff] }
  0x81   : > { %652 = vmatprep.subr.bf16.mxu1 %v603_v32  ;;  %604 = vmatprep.subr.bf16.mxu0 %v603_v32  ;;  %v639_v24 = vpack.c.bf16 %v330_v22, %v328_v21  ;;  %v332_v27 = vld [vmem:[#allocation5 + $0x1e8] sm:$0xff]  ;;  %v334_v28 = vld [vmem:[#allocation5 + $0x1f8] sm:$0xff]  ;;  %v641_v29 = vpack.c.bf16 %v329_v26, %v327_v25  ;;  %v331_v31 = vld [vmem:[#allocation5 + $0x1e0] sm:$0xff] }
  0x82   : > { %v643_v30 = vpack.c.bf16 %v334_v28, %v332_v27  ;;  %v333_v32 = vld [vmem:[#allocation5 + $0x1f0] sm:$0xff]  ;;  %v270_v36 = vld [vmem:[%s1170_s4 + $0x28] sm:$0xf]  ;;  %v335_v41 = vld [vmem:[#allocation7] sm:$0x3] }
  0x83   : > { %v645_v33 = vpack.c.bf16 %v333_v32, %v331_v31  ;;  %v267_v34 = vld [vmem:[%s1170_s4 + $0x10] sm:$0xff]  ;;  %v265_v35 = vld [vmem:[%s1170_s4] sm:$0xff] }
  0x84   : > { %668 = vmatpush1.bf16.msra.mxu1 %v605_v37  ;;  %606 = vmatpush1.bf16.msra.mxu0 %v605_v37  ;;  %v269_v37 = vld [vmem:[%s1170_s4 + $0x20] sm:$0xf] }
  0x85   : > { %653 = vmatprep.subr.bf16.mxu1 %v607_v38  ;;  %608 = vmatprep.subr.bf16.mxu0 %v607_v38  ;;  %v337_v38 = vlaneseq }
  0x87   : > { %v338_v39 = vshrl.u32 %v337_v38, 7 }
  0x88   : > { %669 = vmatpush1.bf16.msra.mxu1 %v609_v45  ;;  %610 = vmatpush1.bf16.msra.mxu0 %v609_v45 }
  0x89   : > { %654 = vmatprep.subr.bf16.mxu1 %v611_v46  ;;  %612 = vmatprep.subr.bf16.mxu0 %v611_v46  ;;  %v339_v40 = vsub.s32 0, %v338_v39  ;;  %v343_v42 = vsub.s32 1, %v338_v39 }
  0x8b   : > { %v340_v43 = vrot.slane %v335_v41, %v339_v40  ;;  %v344_v44 = vrot.slane %v335_v41, %v343_v42 }
  0x8c   : > { %670 = vmatpush1.bf16.msra.mxu1 %v613_v51  ;;  %614 = vmatpush1.bf16.msra.mxu0 %v613_v51 }
  0x8d   : > { %655 = vmatprep.subr.bf16.mxu1 %v615_v52  ;;  %616 = vmatprep.subr.bf16.mxu0 %v615_v52 }
  0x90   : > { %671 = vmatpush1.bf16.msra.mxu1 %v617_v57  ;;  %618 = vmatpush1.bf16.msra.mxu0 %v617_v57 }
  0x91   : > { %656 = vmatprep.subr.bf16.mxu1 %v619_v58  ;;  %620 = vmatprep.subr.bf16.mxu0 %v619_v58 }
  0x94   : > { %672 = vmatpush1.bf16.msra.mxu1 %v621_v63  ;;  %622 = vmatpush1.bf16.msra.mxu0 %v621_v63 }
  0x95   : > { %657 = vmatprep.subr.bf16.mxu1 %v623_v0  ;;  %624 = vmatprep.subr.bf16.mxu0 %v623_v0 }
  0x98   : > { %673 = vmatpush1.bf16.msra.mxu1 %v625_v5  ;;  %626 = vmatpush1.bf16.msra.mxu0 %v625_v5 }
  0x99   : > { %658 = vmatprep.subr.bf16.mxu1 %v627_v6  ;;  %628 = vmatprep.subr.bf16.mxu0 %v627_v6 }
  0x9c   : > { %674 = vmatpush1.bf16.msra.mxu1 %v629_v11  ;;  %630 = vmatpush1.bf16.msra.mxu0 %v629_v11 }
  0x9d   : > { %659 = vmatprep.subr.bf16.mxu1 %v631_v12  ;;  %632 = vmatprep.subr.bf16.mxu0 %v631_v12 }
  0xa0   : > { %675 = vmatpush1.bf16.msra.mxu1 %v633_v17  ;;  %634 = vmatpush1.bf16.msra.mxu0 %v633_v17 }
  0xa1   : > { %660 = vmatprep.subr.bf16.mxu1 %v635_v18  ;;  %636 = vmatprep.subr.bf16.mxu0 %v635_v18 }
  0xa4   : > { %676 = vmatpush1.bf16.msra.mxu1 %v637_v23  ;;  %638 = vmatpush1.bf16.msra.mxu0 %v637_v23 }
  0xa5   : > { %661 = vmatprep.subr.bf16.mxu1 %v639_v24  ;;  %640 = vmatprep.subr.bf16.mxu0 %v639_v24 }
  0xa8   : > { %677 = vmatpush1.bf16.msra.mxu1 %v641_v29  ;;  %642 = vmatpush1.bf16.msra.mxu0 %v641_v29 }
  0xa9   : > { %662 = vmatprep.subr.bf16.mxu1 %v643_v30  ;;  %644 = vmatprep.subr.bf16.mxu0 %v643_v30 }
  0xac   : > { %678 = vmatpush1.bf16.msra.mxu1 %v645_v33  ;;  %646 = vmatpush1.bf16.msra.mxu0 %v645_v33 }
  0xaf   : > { %418 = vmatmul.mubr.f32.vlgmr.msra.gmra.mrb[0].mxu1 %v267_v34  ;;  %412 = vmatmul.mubr.f32.vlgmr.msra.gmra.mrb[0].mxu0 %v265_v35 }
  0xb0   : > { %423 = vmatprep.mubr.f32.mxu1 %v270_v36 }
  0xb3   : > { %424 = vmatmul.mubr.f32.gmra.mrb[2].mxu1 %v269_v37 }
 0x182   : > { %v419_v45 = vpop.f32.mrb[0].mxu1  ;;  %v413_v46 = vpop.f32.mrb[0].mxu0 }
 0x183   : > { %v420_v47 = vadd.f32 %v419_v45, %v340_v43  ;;  %v421_v48 = vpop.f32.mrb[1].mxu1  ;;  %v414_v49 = vadd.f32 %v413_v46, %v340_v43  ;;  %v415_v50 = vpop.f32.mrb[1].mxu0 }
 0x184   : > { %v422_v51 = vadd.f32 %v421_v48, %v344_v44  ;;  %v416_v52 = vadd.f32 %v415_v50, %v344_v44 }
 0x185   : > { %432 = vst [vmem:[%s259_s20 + $0x10] sm:$0xff] %v420_v47  ;;  %430 = vst [vmem:[%s259_s20] sm:$0xff] %v414_v49 }
 0x186   : > { %433 = vst [vmem:[%s259_s20 + $0x18] sm:$0xff] %v422_v51  ;;  %431 = vst [vmem:[%s259_s20 + $0x8] sm:$0xff] %v416_v52  ;;  %v425_v53 = vpop.f32.mrb[2].mxu1 }
 0x187   : > { %v426_v54 = vadd.f32 %v425_v53, %v340_v43  ;;  %v427_v55 = vpop.f32.mrb[3].mxu1 }
 0x188   : > { %v428_v56 = vadd.f32 %v427_v55, %v344_v44 }
 0x189   : > { %434 = vst [vmem:[%s259_s20 + $0x20] sm:$0xf] %v426_v54 }
 0x18a   : > { %435 = vst [vmem:[%s259_s20 + $0x28] sm:$0xf] %v428_v56 }
 0x18b   : > { %869 = shalt.err (!%p866_p2)
}
 0x18c   : > { %s870_s26 = scalar_lea.hbm %s1194_s8, 768  ;;  %s874_s6 = scalar_lea.hbm %s1246_s3, 1536 }
 0x18d   : > { %p871_p0 = scmp.ne.s32.totalorder %s1194_s8, %s870_s26  ;;  %p875_p6 = scmp.lt.u32.totalorder %s1194_s8, %s1246_s3 }
 0x18e   : > { %p876_p7 = scmp.lt.u32.totalorder %s874_s6, %s870_s26  ;;  %p878_p8 = scmp.lt.u32.totalorder %s870_s26, %s1194_s8 }
 0x18f   : > { %p872_p4 = pnand %p871_p0, %p1261_p12 }
 0x190   : > { %p877_p11 = por %p876_p7, %p875_p6 }
 0x191   : > { %p873_p13 = pneg %p872_p4 }
 0x192   : > { %p879_p1 = por %p878_p8, %p877_p11 }
 0x194   : > { %p880_p10 = pnand %p879_p1, %p873_p13 }
 0x196   : > { %883 = shalt.err (!%p880_p10)
}
 0x197   : > { %s950_s20 = smov 256   ;;  %s951_s24 = smov 16  }
 0x198   : > { %693 = dma.vmem_to_hbm [thread:$0]  (%p1261_p12), %s1189_s22, 768, %s1194_s8, %s437_s15, %s950_s20, %s950_s20, %s951_s24  }
 0x199 PF: > { %s470_s11 = sand.u32 1, %s922_s12   ;;  %p1262_p3 = scmp.ne.s32.totalorder %s1254_s23, 0 }
 0x19a   : > { %p1263_p5 = scmp.ge.s32.totalorder %s942_s17, 2  ;;  %s471_s18 = scalar_lea.sflag [#allocation4], %s470_s11 }
 0x19c   : > { %p707_p9 = pnand %p1263_p5, %p1262_p3 }
 0x19e   : > { %917 = dma.done.wait (!%p707_p9), %s471_s18, 768  }
 0x19f   : > { %919 = vsyncadd (!%p707_p9), %s471_s18, 4294966528  ;;  %s20_s17 = sadd.s32 1, %s942_s17   ;;  %s1264_s12 = smov %s926_s13 }
 0x1a0   : > { %p17_p2 = scmp.ge.s32.totalorder %s20_s17, 4   ;;  %s1265_s13 = smov %s930_s14 }
 0x1a1   : > { %s1266_s14 = smov %s1120_s5  ;;  %s1267_s15 = smov %s938_s16 }
 0x1a2   : > { %s1268_s16 = smov %s1270_s19  ;;  %19 = sbr.rel (!%p17_p2) target bundleno = 7 (0x7), region = 87 }
 0x1a9   :  { %476 = vsyncpa [#allocation3], 1 }
 0x1aa   :  { %478 = vsyncpa [#allocation3 + $0x1], 1 }
 0x1ab   :  { %479 = vsyncpa [#allocation6], 1 }
 0x1ac   :  { %480 = vsyncpa [#allocation4], 1 }
 0x1ad   :  { %482 = vsyncpa [#allocation4 + $0x1], 1 }

// kernel: masking_attention_forward.3
= control target key start
LH: loop header
LB: loop body
LE: loop exit
PB: predicated region body
PF: predicated region fallthrough
CT: control target
= control target key end

     0   :  { %8 = vsyncpa [#allocation3], 0  ;;  %s1739_s0 = inlined_call_operand.hbm [shape: f32[2,20,256], index: 0, kind: input, shape index: {}]   ;;  %s1740_s1 = inlined_call_operand.hbm [shape: f32[256,768], index: 1, kind: input, shape index: {}]   ;;  %s1741_s2 = inlined_call_operand.hbm [shape: f32[1,768], index: 2, kind: input, shape index: {}]   ;;  %s1742_s3 = inlined_call_operand.hbm [shape: f32[2,20,768], index: 3, kind: output, shape index: {}]  }
   0x1   :  { %10 = vsyncpa [#allocation3 + $0x1], 0 }
   0x2   :  { %11 = vsyncpa [#allocation6], 0 }
   0x3   :  { %12 = vsyncpa [#allocation4], 0 }
   0x4   :  { %14 = vsyncpa [#allocation4 + $0x1], 0  ;;  %s1431_s12 = smov 0   ;;  %s1433_s13 = smov 0  }
   0x5   :  { %s1435_s14 = smov 0   ;;  %s1437_s15 = smov 0  }
   0x6   :  { %s1439_s16 = smov 0   ;;  %s1441_s17 = smov 0  }
   0x7 LB: > { %s896_s18 = sadd.s32 4294967295, %s1399_s17   ;;  %s897_s19 = sadd.s32 4294967294, %s1399_s17   ;;  %s1399_s17 = sphi %s1441_s17, %s20_s17   ;;  %s1395_s16 = sphi %s1439_s16, %s1764_s16   ;;  %s1391_s15 = sphi %s1437_s15, %s1763_s15   ;;  %s1387_s14 = sphi %s1435_s14, %s1762_s14   ;;  %s1383_s13 = sphi %s1433_s13, %s1761_s13   ;;  %s1379_s12 = sphi %s1431_s12, %s1760_s12  }
   0x8   : > { %p61_p0 = scmp.ne.s32.totalorder %s1383_s13, %s1379_s12  ;;  %p1465_p1 = scmp.eq.s32.totalorder %s896_s18, 0 }
   0x9   : > { %p1469_p2 = scmp.eq.s32.totalorder %s896_s18, 1  ;;  %p147_p3 = scmp.eq.s32.totalorder %s897_s19, 1 }
   0xa   : > { %s1747_s20 = scalar_select %p1465_p1, 1, 0 }
   0xb   : > { %p1475_p4 = por %p1465_p1, %p61_p0  ;;  %p898_p5 = scmp.ge.s32.totalorder %s1399_s17, 1 }
   0xc   : > { %p1480_p6 = por %p147_p3, %p61_p0  ;;  %p154_p7 = scmp.lt.s32.totalorder %s1399_s17, 3 }
   0xd   : > { %s1749_s22 = scalar_select %p1475_p4, 1, 0 }
   0xe   : > { %s1750_s23 = scalar_select %p1480_p6, 1, 0 }
   0xf   : > { %p1485_p8 = pnand %p898_p5, %p154_p7  ;;  %s1401_s25 = smov [#allocation5]  }
  0x10   : > { %s169_s26 = sshll.u32 %s1401_s25, 4  ;;  %s1402_s28 = smov [#allocation7]   ;;  %s1489_s26 = int_to_ptr.vmem [resolvable:$true] %s169_s26 }
  0x11   : > { %p1150_p9 = pneg %p1485_p8  ;;  %s186_s29 = sshll.u32 %s1402_s28, 4  ;;  %s1500_s29 = int_to_ptr.vmem [resolvable:$true] %s186_s29 }
  0x12   : > { %s1227_s5 = scalar_lea.hbm %s1740_s1, 24576 }
  0x13   : > { %p1496_p11 = pnand %p1150_p9, %p1465_p1  ;;  %p1228_p12 = scmp.ne.s32.totalorder %s1740_s1, %s1227_s5 }
  0x14   : > { %p1234_p5 = scmp.lt.u32.totalorder %s1227_s5, %s1740_s1 }
  0x15   : > { %p1229_p13 = pneg %p1496_p11 }
  0x17   : > { %p1230_p0 = pnand %p1229_p13, %p1228_p12 }
  0x19   : > { %p1231_p3 = pneg %p1230_p0 }
  0x1b   : > { %p1236_p7 = pnand %p1234_p5, %p1231_p3 }
  0x1d   : > { %1239 = shalt.err (!%p1236_p7)
}
  0x1e   : > { %s1240_s10 = scalar_lea.vmem %s1489_s26, 24576  ;;  %p1248_p1 = scmp.lt.s32.totalorder %s1489_s26, %s1489_s26 }
  0x1f   : > { %p1241_p9 = scmp.ne.s32.totalorder %s1489_s26, %s1240_s10  ;;  %p1249_p12 = scmp.lt.s32.totalorder %s1240_s10, %s1240_s10 }
  0x21   : > { %p1243_p10 = pnand %p1241_p9, %p1229_p13  ;;  %p1250_p0 = por %p1249_p12, %p1248_p1 }
  0x23   : > { %p1244_p6 = pneg %p1243_p10 }
  0x25   : > { %p1251_p4 = pnand %p1250_p0, %p1244_p6 }
  0x27   : > { %1254 = shalt.err (!%p1251_p4)
}
  0x28   : > { %s1403_s11 = smov 768   ;;  %s1404_s18 = smov 48  }
  0x29   : > { %1153 = dma.hbm_to_vmem [thread:$0]  (!%p1496_p11), %s1740_s1, 24576, %s1489_s26, [#allocation6], %s1403_s11, %s1403_s11, %s1404_s18  }
  0x2a   : > { %s1255_s4 = scalar_lea.hbm %s1741_s2, 96 }
  0x2b   : > { %p1256_p1 = scmp.ne.s32.totalorder %s1741_s2, %s1255_s4  ;;  %p1262_p10 = scmp.lt.u32.totalorder %s1255_s4, %s1741_s2 }
  0x2d   : > { %p1258_p4 = pnand %p1256_p1, %p1229_p13 }
  0x2f   : > { %p1259_p6 = pneg %p1258_p4 }
  0x31   : > { %p1264_p3 = pnand %p1262_p10, %p1259_p6 }
  0x33   : > { %1267 = shalt.err (!%p1264_p3)
}
  0x34   : > { %s1268_s26 = scalar_lea.vmem %s1500_s29, 96  ;;  %p1276_p12 = scmp.lt.s32.totalorder %s1500_s29, %s1500_s29 }
  0x35   : > { %p1269_p5 = scmp.ne.s32.totalorder %s1500_s29, %s1268_s26  ;;  %p1277_p0 = scmp.lt.s32.totalorder %s1268_s26, %s1268_s26 }
  0x37   : > { %p1271_p7 = pnand %p1269_p5, %p1229_p13  ;;  %p1278_p1 = por %p1277_p0, %p1276_p12 }
  0x39   : > { %p1272_p9 = pneg %p1271_p7 }
  0x3b   : > { %p1279_p4 = pnand %p1278_p1, %p1272_p9 }
  0x3d   : > { %1282 = shalt.err (!%p1279_p4)
}
  0x3e   : > { %1156 = dma.hbm_to_vmem [thread:$0]  (!%p1496_p11), %s1741_s2, 96, %s1500_s29, [#allocation6]  }
  0x3f   : > { %s39_s11 = sadd.s32 1, %s1395_s16  ;;  %s48_s18 = sadd.s32 1, %s1387_s14 }
  0x40   : > { %p41_p13 = scmp.ge.s32.totalorder %s39_s11, 2  ;;  %p55_p6 = scmp.ne.s32.totalorder %s1387_s14, %s1383_s13 }
  0x41   : > { %p56_p10 = scmp.eq.s32.totalorder %s1399_s17, 0  ;;  %p1167_p3 = scmp.lt.s32.totalorder %s1399_s17, 2 }
  0x42   : > { %s1766_s11 = smov (%p41_p13, %s39_s11), 0  ;;  %p1564_p7 = por %p1469_p2, %p55_p6 }
  0x43   : > { %p57_p5 = por %p56_p10, %p55_p6  ;;  %s43_s19 = ssub.s32 %s1395_s16, %s1766_s11 }
  0x44   : > { %s1753_s27 = scalar_select %p1564_p7, 1, 0 }
  0x45   : > { %s197_s25 = sand.u32 1, %s1387_s14   ;;  %p46_p9 = scmp.eq.s32.totalorder %s43_s19, 0 }
  0x46   : > { %s1133_s29 = smul.u32 48, %s197_s25  ;;  %p1571_p11 = pnand %p1167_p3, %p57_p5 }
  0x47   : > { %s1576_s30 = scalar_select %p46_p9, %s1387_s14, %s48_s18  }
  0x48   : > { %s1134_s4 = smul.u32 768, %s1395_s16  ;;  %s201_s5 = scalar_lea.vmem [#allocation2], %s1133_s29 }
  0x49   : > { %s211_s6 = sshll.u32 %s201_s5, 4  ;;  %s1586_s26 = scalar_lea.sflag [#allocation3], %s197_s25  ;;  %s1584_s6 = int_to_ptr.vmem [resolvable:$true] %s211_s6 }
  0x4a   : > { %s1582_s8 = scalar_lea.hbm %s1739_s0, %s1134_s4  ;;  %p1285_p12 = pneg %p1571_p11 }
  0x4b   : > { %s1283_s9 = scalar_lea.hbm %s1582_s8, 768  ;;  %s1288_s19 = scalar_lea.hbm %s1739_s0, 1536 }
  0x4c   : > { %p1284_p2 = scmp.ne.s32.totalorder %s1582_s8, %s1283_s9  ;;  %p1289_p4 = scmp.lt.u32.totalorder %s1582_s8, %s1739_s0 }
  0x4d   : > { %p1290_p13 = scmp.lt.u32.totalorder %s1288_s19, %s1283_s9  ;;  %p1292_p10 = scmp.lt.u32.totalorder %s1283_s9, %s1582_s8 }
  0x4e   : > { %p1286_p0 = pnand %p1285_p12, %p1284_p2 }
  0x4f   : > { %p1291_p6 = por %p1290_p13, %p1289_p4 }
  0x50   : > { %p1287_p1 = pneg %p1286_p0 }
  0x51   : > { %p1293_p3 = por %p1292_p10, %p1291_p6 }
  0x53   : > { %p1294_p5 = pnand %p1293_p3, %p1287_p1 }
  0x55   : > { %1297 = shalt.err (!%p1294_p5)
}
  0x56   : > { %s1298_s25 = scalar_lea.vmem %s1584_s6, 768  ;;  %s1405_s5 = smov [#allocation2]  }
  0x57   : > { %p1299_p9 = scmp.ne.s32.totalorder %s1584_s6, %s1298_s25  ;;  %s1303_s21 = sshll.u32 %s1405_s5, 4  ;;  %s1304_s21 = int_to_ptr.vmem [resolvable:$false] %s1303_s21 }
  0x58   : > { %s1305_s7 = scalar_lea.vmem %s1304_s21, 1536  ;;  %p1306_p7 = scmp.lt.s32.totalorder %s1584_s6, %s1304_s21 }
  0x59   : > { %p1301_p2 = pnand %p1299_p9, %p1285_p12  ;;  %p1307_p4 = scmp.lt.s32.totalorder %s1305_s7, %s1298_s25 }
  0x5b   : > { %p1302_p0 = pneg %p1301_p2  ;;  %p1308_p13 = por %p1307_p4, %p1306_p7 }
  0x5d   : > { %p1309_p6 = pnand %p1308_p13, %p1302_p0 }
  0x5f   : > { %1312 = shalt.err (!%p1309_p6)
}
  0x60   : > { %s1406_s9 = smov 256   ;;  %s1407_s10 = smov 16  }
  0x61   : > { %1160 = dma.hbm_to_vmem [thread:$0]  (!%p1571_p11), %s1582_s8, 768, %s1584_s6, %s1586_s26, %s1406_s9, %s1406_s9, %s1407_s10  }
  0x62   : > { %223 = sbr.rel (%p1485_p8) target bundleno = 474 (0x1da), region = 32  ;;  %s1617_s18 = sand.u32 (!%p1485_p8), 1, %s1383_s13  }
  0x63   : > { %s1135_s19 = smul.u32 (!%p1485_p8), 48, %s1617_s18  ;;  %s226_s29 = scalar_lea.sflag (!%p1485_p8), [#allocation3], %s1617_s18 }
  0x64   : > { %p1755_p7 = scmp.ne.s32.totalorder (!%p1485_p8), %s1749_s22, 0 }
  0x65   : > { %s1621_s4 = scalar_lea.vmem (!%p1485_p8), [#allocation2], %s1135_s19 }
  0x69   : > { %1366 = dma.done.wait (%p1755_p7), %s226_s29, 768  }
  0x6a   : > { %1368 = vsyncadd (%p1755_p7), %s226_s29, 4294966528  ;;  %p1756_p11 = scmp.ne.s32.totalorder %s1747_s20, 0 }
  0x6c   : > { %1370 = dma.done.wait (%p1756_p11), [#allocation6], 24672  }
  0x6d   : > { %1372 = vsyncadd (%p1756_p11), [#allocation6], 4294942624  ;;  %v274_v0 = vld [vmem:[#allocation5 + $0x18] sm:$0xff]  ;;  %v280_v1 = vld [vmem:[#allocation5 + $0x48] sm:$0xff]  ;;  %s1136_s20 = smul.u32 144, %s1617_s18  ;;  %s763_s26 = scalar_lea.sflag [#allocation4], %s1617_s18 }
  0x6e   : > { %v273_v2 = vld [vmem:[#allocation5 + $0x10] sm:$0xff]  ;;  %v973_v3 = vpack.c.bf16 %v280_v1, %v274_v0  ;;  %v279_v4 = vld [vmem:[#allocation5 + $0x40] sm:$0xff]  ;;  %v272_v5 = vld [vmem:[#allocation5 + $0x8] sm:$0xff]  ;;  %s1137_s24 = smul.u32 2304, %s1391_s15  ;;  %p1757_p12 = scmp.ne.s32.totalorder %s1753_s27, 0 }
  0x6f   : > { %v278_v6 = vld [vmem:[#allocation5 + $0x38] sm:$0xff]  ;;  %v975_v7 = vpack.c.bf16 %v279_v4, %v273_v2  ;;  %v271_v9 = vld [vmem:[#allocation5] sm:$0xff]  ;;  %v277_v10 = vld [vmem:[#allocation5 + $0x30] sm:$0xff]  ;;  %s1663_s22 = scalar_lea.vmem [#allocation8], %s1136_s20  ;;  %s1408_s5 = smov [#allocation8]  }
  0x70   : > { %v909_v8 = vpack.c.bf16 %v278_v6, %v272_v5  ;;  %v286_v11 = vld [vmem:[#allocation5 + $0x78] sm:$0xff]  ;;  %974 = vmatprep.subr.bf16.mxu1 %v973_v3  ;;  %v911_v12 = vpack.c.bf16 %v277_v10, %v271_v9  ;;  %v292_v13 = vld [vmem:[#allocation5 + $0xa8] sm:$0xff]  ;;  %v285_v14 = vld [vmem:[#allocation5 + $0x70] sm:$0xff]  ;;  %s781_s28 = sshll.u32 %s1663_s22, 4  ;;  %s1686_s15 = scalar_lea.hbm %s1742_s3, %s1137_s24  ;;  %s1688_s28 = int_to_ptr.vmem [resolvable:$true] %s781_s28 }
  0x71   : > { %v291_v15 = vld [vmem:[#allocation5 + $0xa0] sm:$0xff]  ;;  %976 = vmatpush1.bf16.msra.mxu1 %v975_v7  ;;  %v977_v16 = vpack.c.bf16 %v292_v13, %v286_v11  ;;  %v284_v18 = vld [vmem:[#allocation5 + $0x68] sm:$0xff]  ;;  %v290_v19 = vld [vmem:[#allocation5 + $0x98] sm:$0xff]  ;;  %s1313_s25 = scalar_lea.vmem %s1688_s28, 2304  ;;  %s1317_s21 = sshll.u32 %s1408_s5, 4  ;;  %s1318_s21 = int_to_ptr.vmem [resolvable:$false] %s1317_s21 }
  0x72   : > { %910 = vmatprep.subr.bf16.mxu0 %v909_v8  ;;  %v979_v17 = vpack.c.bf16 %v291_v15, %v285_v14  ;;  %v283_v20 = vld [vmem:[#allocation5 + $0x60] sm:$0xff]  ;;  %v913_v21 = vpack.c.bf16 %v290_v19, %v284_v18  ;;  %v289_v22 = vld [vmem:[#allocation5 + $0x90] sm:$0xff]  ;;  %v298_v23 = vld [vmem:[#allocation5 + $0xd8] sm:$0xff]  ;;  %p1314_p8 = scmp.ne.s32.totalorder %s1688_s28, %s1313_s25  ;;  %s1319_s7 = scalar_lea.vmem %s1318_s21, 4608 }
  0x73   : > { %912 = vmatpush1.bf16.msra.mxu0 %v911_v12  ;;  %v304_v24 = vld [vmem:[#allocation5 + $0x108] sm:$0xff]  ;;  %978 = vmatprep.subr.bf16.mxu1 %v977_v16  ;;  %v915_v25 = vpack.c.bf16 %v289_v22, %v283_v20  ;;  %v297_v27 = vld [vmem:[#allocation5 + $0xd0] sm:$0xff]  ;;  %v303_v28 = vld [vmem:[#allocation5 + $0x100] sm:$0xff]  ;;  %p1320_p3 = scmp.lt.s32.totalorder %s1688_s28, %s1318_s21  ;;  %p1321_p5 = scmp.lt.s32.totalorder %s1319_s7, %s1313_s25 }
  0x74   : > { %v981_v26 = vpack.c.bf16 %v304_v24, %v298_v23  ;;  %v296_v29 = vld [vmem:[#allocation5 + $0xc8] sm:$0xff]  ;;  %914 = vmatprep.subr.bf16.mxu0 %v913_v21  ;;  %v302_v30 = vld [vmem:[#allocation5 + $0xf8] sm:$0xff]  ;;  %v295_v31 = vld [vmem:[#allocation5 + $0xc0] sm:$0xff]  ;;  %v983_v33 = vpack.c.bf16 %v303_v28, %v297_v27  ;;  %p1315_p1 = pnand %p1314_p8, %p1757_p12 }
  0x75   : > { %v301_v32 = vld [vmem:[#allocation5 + $0xf0] sm:$0xff]  ;;  %980 = vmatpush1.bf16.msra.mxu1 %v979_v17  ;;  %v917_v34 = vpack.c.bf16 %v302_v30, %v296_v29  ;;  %v310_v35 = vld [vmem:[#allocation5 + $0x138] sm:$0xff]  ;;  %v316_v36 = vld [vmem:[#allocation5 + $0x168] sm:$0xff]  ;;  %p1322_p9 = por %p1321_p5, %p1320_p3 }
  0x76   : > { %v309_v37 = vld [vmem:[#allocation5 + $0x130] sm:$0xff]  ;;  %982 = vmatprep.subr.bf16.mxu1 %v981_v26  ;;  %v919_v38 = vpack.c.bf16 %v301_v32, %v295_v31  ;;  %v985_v39 = vpack.c.bf16 %v316_v36, %v310_v35  ;;  %v315_v40 = vld [vmem:[#allocation5 + $0x160] sm:$0xff]  ;;  %v308_v41 = vld [vmem:[#allocation5 + $0x128] sm:$0xff]  ;;  %p1316_p10 = pneg %p1315_p1 }
  0x77   : > { %916 = vmatpush1.bf16.msra.mxu0 %v915_v25  ;;  %v314_v42 = vld [vmem:[#allocation5 + $0x158] sm:$0xff]  ;;  %v307_v44 = vld [vmem:[#allocation5 + $0x120] sm:$0xff]  ;;  %v313_v45 = vld [vmem:[#allocation5 + $0x150] sm:$0xff]  ;;  %v987_v48 = vpack.c.bf16 %v315_v40, %v309_v37 }
  0x78   : > { %918 = vmatprep.subr.bf16.mxu0 %v917_v34  ;;  %v921_v43 = vpack.c.bf16 %v314_v42, %v308_v41  ;;  %v322_v46 = vld [vmem:[#allocation5 + $0x198] sm:$0xff]  ;;  %v328_v47 = vld [vmem:[#allocation5 + $0x1c8] sm:$0xff]  ;;  %v923_v51 = vpack.c.bf16 %v313_v45, %v307_v44  ;;  %v321_v53 = vld [vmem:[#allocation5 + $0x190] sm:$0xff]  ;;  %p1323_p2 = pnand %p1322_p9, %p1316_p10 }
  0x79   : > { %984 = vmatpush1.bf16.msra.mxu1 %v983_v33  ;;  %v320_v49 = vld [vmem:[#allocation5 + $0x188] sm:$0xff]  ;;  %v326_v50 = vld [vmem:[#allocation5 + $0x1b8] sm:$0xff]  ;;  %v989_v52 = vpack.c.bf16 %v328_v47, %v322_v46  ;;  %v327_v54 = vld [vmem:[#allocation5 + $0x1c0] sm:$0xff] }
  0x7a   : > { %986 = vmatprep.subr.bf16.mxu1 %v985_v39  ;;  %v319_v55 = vld [vmem:[#allocation5 + $0x180] sm:$0xff]  ;;  %v925_v56 = vpack.c.bf16 %v326_v50, %v320_v49  ;;  %v325_v57 = vld [vmem:[#allocation5 + $0x1b0] sm:$0xff]  ;;  %v334_v58 = vld [vmem:[#allocation5 + $0x1f8] sm:$0xff]  ;;  %v991_v62 = vpack.c.bf16 %v327_v54, %v321_v53 }
  0x7b   : > { %920 = vmatpush1.bf16.msra.mxu0 %v919_v38  ;;  %v340_v59 = vld [vmem:[#allocation5 + $0x228] sm:$0xff]  ;;  %v338_v61 = vld [vmem:[#allocation5 + $0x218] sm:$0xff]  ;;  %v927_v63 = vpack.c.bf16 %v325_v57, %v319_v55  ;;  %v333_v1 = vld [vmem:[#allocation5 + $0x1f0] sm:$0xff] }
  0x7c   : > { %922 = vmatprep.subr.bf16.mxu0 %v921_v43  ;;  %v332_v60 = vld [vmem:[#allocation5 + $0x1e8] sm:$0xff]  ;;  %v993_v0 = vpack.c.bf16 %v340_v59, %v334_v58  ;;  %v339_v2 = vld [vmem:[#allocation5 + $0x220] sm:$0xff]  ;;  %v337_v5 = vld [vmem:[#allocation5 + $0x210] sm:$0xff] }
  0x7d   : > { %988 = vmatpush1.bf16.msra.mxu1 %v987_v48  ;;  %v331_v3 = vld [vmem:[#allocation5 + $0x1e0] sm:$0xff]  ;;  %v929_v4 = vpack.c.bf16 %v338_v61, %v332_v60  ;;  %v346_v6 = vld [vmem:[#allocation5 + $0x258] sm:$0xff]  ;;  %v352_v7 = vld [vmem:[#allocation5 + $0x288] sm:$0xff]  ;;  %v995_v10 = vpack.c.bf16 %v339_v2, %v333_v1 }
  0x7e   : > { %990 = vmatprep.subr.bf16.mxu1 %v989_v52  ;;  %v344_v8 = vld [vmem:[#allocation5 + $0x248] sm:$0xff]  ;;  %v350_v9 = vld [vmem:[#allocation5 + $0x278] sm:$0xff]  ;;  %v931_v11 = vpack.c.bf16 %v337_v5, %v331_v3  ;;  %v997_v12 = vpack.c.bf16 %v352_v7, %v346_v6  ;;  %v345_v13 = vld [vmem:[#allocation5 + $0x250] sm:$0xff] }
  0x7f   : > { %924 = vmatpush1.bf16.msra.mxu0 %v923_v51  ;;  %v351_v14 = vld [vmem:[#allocation5 + $0x280] sm:$0xff]  ;;  %v933_v16 = vpack.c.bf16 %v350_v9, %v344_v8  ;;  %v349_v17 = vld [vmem:[#allocation5 + $0x270] sm:$0xff]  ;;  %v358_v18 = vld [vmem:[#allocation5 + $0x2b8] sm:$0xff] }
  0x80   : > { %926 = vmatprep.subr.bf16.mxu0 %v925_v56  ;;  %v343_v15 = vld [vmem:[#allocation5 + $0x240] sm:$0xff]  ;;  %v364_v19 = vld [vmem:[#allocation5 + $0x2e8] sm:$0xff]  ;;  %v362_v21 = vld [vmem:[#allocation5 + $0x2d8] sm:$0xff]  ;;  %v999_v22 = vpack.c.bf16 %v351_v14, %v345_v13 }
  0x81   : > { %992 = vmatpush1.bf16.msra.mxu1 %v991_v62  ;;  %v356_v20 = vld [vmem:[#allocation5 + $0x2a8] sm:$0xff]  ;;  %v935_v23 = vpack.c.bf16 %v349_v17, %v343_v15  ;;  %v1001_v24 = vpack.c.bf16 %v364_v19, %v358_v18  ;;  %v357_v25 = vld [vmem:[#allocation5 + $0x2b0] sm:$0xff]  ;;  %v363_v26 = vld [vmem:[#allocation5 + $0x2e0] sm:$0xff] }
  0x82   : > { %994 = vmatprep.subr.bf16.mxu1 %v993_v0  ;;  %v355_v27 = vld [vmem:[#allocation5 + $0x2a0] sm:$0xff]  ;;  %v937_v28 = vpack.c.bf16 %v362_v21, %v356_v20  ;;  %v361_v29 = vld [vmem:[#allocation5 + $0x2d0] sm:$0xff]  ;;  %v370_v30 = vld [vmem:[#allocation5 + $0x318] sm:$0xff]  ;;  %v1003_v34 = vpack.c.bf16 %v363_v26, %v357_v25 }
  0x83   : > { %928 = vmatpush1.bf16.msra.mxu0 %v927_v63  ;;  %v376_v31 = vld [vmem:[#allocation5 + $0x348] sm:$0xff]  ;;  %v374_v33 = vld [vmem:[#allocation5 + $0x338] sm:$0xff]  ;;  %v939_v35 = vpack.c.bf16 %v361_v29, %v355_v27  ;;  %v369_v37 = vld [vmem:[#allocation5 + $0x310] sm:$0xff] }
  0x84   : > { %930 = vmatprep.subr.bf16.mxu0 %v929_v4  ;;  %v368_v32 = vld [vmem:[#allocation5 + $0x308] sm:$0xff]  ;;  %v1005_v36 = vpack.c.bf16 %v376_v31, %v370_v30  ;;  %v375_v38 = vld [vmem:[#allocation5 + $0x340] sm:$0xff]  ;;  %v373_v41 = vld [vmem:[#allocation5 + $0x330] sm:$0xff] }
  0x85   : > { %996 = vmatpush1.bf16.msra.mxu1 %v995_v10  ;;  %v367_v39 = vld [vmem:[#allocation5 + $0x300] sm:$0xff]  ;;  %v941_v40 = vpack.c.bf16 %v374_v33, %v368_v32  ;;  %v382_v42 = vld [vmem:[#allocation5 + $0x378] sm:$0xff]  ;;  %v388_v43 = vld [vmem:[#allocation5 + $0x3a8] sm:$0xff]  ;;  %v1007_v46 = vpack.c.bf16 %v375_v38, %v369_v37 }
  0x86   : > { %998 = vmatprep.subr.bf16.mxu1 %v997_v12  ;;  %v380_v44 = vld [vmem:[#allocation5 + $0x368] sm:$0xff]  ;;  %v386_v45 = vld [vmem:[#allocation5 + $0x398] sm:$0xff]  ;;  %v943_v47 = vpack.c.bf16 %v373_v41, %v367_v39  ;;  %v1009_v48 = vpack.c.bf16 %v388_v43, %v382_v42  ;;  %v381_v49 = vld [vmem:[#allocation5 + $0x370] sm:$0xff] }
  0x87   : > { %932 = vmatpush1.bf16.msra.mxu0 %v931_v11  ;;  %v387_v50 = vld [vmem:[#allocation5 + $0x3a0] sm:$0xff]  ;;  %v945_v52 = vpack.c.bf16 %v386_v45, %v380_v44  ;;  %v385_v53 = vld [vmem:[#allocation5 + $0x390] sm:$0xff]  ;;  %v394_v54 = vld [vmem:[#allocation5 + $0x3d8] sm:$0xff] }
  0x88   : > { %934 = vmatprep.subr.bf16.mxu0 %v933_v16  ;;  %v379_v51 = vld [vmem:[#allocation5 + $0x360] sm:$0xff]  ;;  %v400_v55 = vld [vmem:[#allocation5 + $0x408] sm:$0xff]  ;;  %v398_v57 = vld [vmem:[#allocation5 + $0x3f8] sm:$0xff]  ;;  %v1011_v58 = vpack.c.bf16 %v387_v50, %v381_v49 }
  0x89   : > { %1000 = vmatpush1.bf16.msra.mxu1 %v999_v22  ;;  %v392_v56 = vld [vmem:[#allocation5 + $0x3c8] sm:$0xff]  ;;  %v947_v59 = vpack.c.bf16 %v385_v53, %v379_v51  ;;  %v1013_v60 = vpack.c.bf16 %v400_v55, %v394_v54  ;;  %v393_v61 = vld [vmem:[#allocation5 + $0x3d0] sm:$0xff]  ;;  %v399_v62 = vld [vmem:[#allocation5 + $0x400] sm:$0xff] }
  0x8a   : > { %1002 = vmatprep.subr.bf16.mxu1 %v1001_v24  ;;  %v391_v63 = vld [vmem:[#allocation5 + $0x3c0] sm:$0xff]  ;;  %v949_v0 = vpack.c.bf16 %v398_v57, %v392_v56  ;;  %v397_v1 = vld [vmem:[#allocation5 + $0x3f0] sm:$0xff]  ;;  %v406_v2 = vld [vmem:[#allocation5 + $0x438] sm:$0xff]  ;;  %v1015_v6 = vpack.c.bf16 %v399_v62, %v393_v61 }
  0x8b   : > { %936 = vmatpush1.bf16.msra.mxu0 %v935_v23  ;;  %v412_v3 = vld [vmem:[#allocation5 + $0x468] sm:$0xff]  ;;  %v410_v5 = vld [vmem:[#allocation5 + $0x458] sm:$0xff]  ;;  %v405_v7 = vld [vmem:[#allocation5 + $0x430] sm:$0xff]  ;;  %v951_v8 = vpack.c.bf16 %v397_v1, %v391_v63 }
  0x8c   : > { %938 = vmatprep.subr.bf16.mxu0 %v937_v28  ;;  %v404_v4 = vld [vmem:[#allocation5 + $0x428] sm:$0xff]  ;;  %v1017_v9 = vpack.c.bf16 %v412_v3, %v406_v2  ;;  %v411_v10 = vld [vmem:[#allocation5 + $0x460] sm:$0xff]  ;;  %v409_v12 = vld [vmem:[#allocation5 + $0x450] sm:$0xff] }
  0x8d   : > { %1004 = vmatpush1.bf16.msra.mxu1 %v1003_v34  ;;  %v403_v11 = vld [vmem:[#allocation5 + $0x420] sm:$0xff]  ;;  %v953_v13 = vpack.c.bf16 %v410_v5, %v404_v4  ;;  %v418_v14 = vld [vmem:[#allocation5 + $0x498] sm:$0xff]  ;;  %v424_v15 = vld [vmem:[#allocation5 + $0x4c8] sm:$0xff]  ;;  %v1019_v19 = vpack.c.bf16 %v411_v10, %v405_v7 }
  0x8e   : > { %1006 = vmatprep.subr.bf16.mxu1 %v1005_v36  ;;  %v1632_v16 = vld [vmem:[%s1621_s4 + $0x8] sm:$0xff]  ;;  %v955_v20 = vpack.c.bf16 %v409_v12, %v403_v11  ;;  %v1021_v21 = vpack.c.bf16 %v424_v15, %v418_v14  ;;  %v417_v22 = vld [vmem:[#allocation5 + $0x490] sm:$0xff]  ;;  %v423_v23 = vld [vmem:[#allocation5 + $0x4c0] sm:$0xff] }
  0x8f   : > { %940 = vmatpush1.bf16.msra.mxu0 %v939_v35  ;;  %v416_v17 = vld [vmem:[#allocation5 + $0x488] sm:$0xff]  ;;  %v422_v18 = vld [vmem:[#allocation5 + $0x4b8] sm:$0xff]  ;;  %642 = vmatprep.mubr.f32.mxu1 %v1632_v16  ;;  %v415_v24 = vld [vmem:[#allocation5 + $0x480] sm:$0xff]  ;;  %v1023_v31 = vpack.c.bf16 %v423_v23, %v417_v22 }
  0x90   : > { %942 = vmatprep.subr.bf16.mxu0 %v941_v40  ;;  %559 = vmatprep.mubr.f32.mxu0 %v1632_v16  ;;  %v957_v25 = vpack.c.bf16 %v422_v18, %v416_v17  ;;  %v421_v26 = vld [vmem:[#allocation5 + $0x4b0] sm:$0xff]  ;;  %v430_v27 = vld [vmem:[#allocation5 + $0x4f8] sm:$0xff]  ;;  %v436_v28 = vld [vmem:[#allocation5 + $0x528] sm:$0xff] }
  0x91   : > { %1008 = vmatpush1.bf16.msra.mxu1 %v1007_v46  ;;  %v428_v29 = vld [vmem:[#allocation5 + $0x4e8] sm:$0xff]  ;;  %v434_v30 = vld [vmem:[#allocation5 + $0x518] sm:$0xff]  ;;  %v959_v32 = vpack.c.bf16 %v421_v26, %v415_v24  ;;  %v1025_v33 = vpack.c.bf16 %v436_v28, %v430_v27  ;;  %v429_v34 = vld [vmem:[#allocation5 + $0x4f0] sm:$0xff] }
  0x92   : > { %1010 = vmatprep.subr.bf16.mxu1 %v1009_v48  ;;  %v435_v35 = vld [vmem:[#allocation5 + $0x520] sm:$0xff]  ;;  %v961_v37 = vpack.c.bf16 %v434_v30, %v428_v29  ;;  %v433_v38 = vld [vmem:[#allocation5 + $0x510] sm:$0xff]  ;;  %v442_v39 = vld [vmem:[#allocation5 + $0x558] sm:$0xff] }
  0x93   : > { %944 = vmatpush1.bf16.msra.mxu0 %v943_v47  ;;  %v427_v36 = vld [vmem:[#allocation5 + $0x4e0] sm:$0xff]  ;;  %v448_v40 = vld [vmem:[#allocation5 + $0x588] sm:$0xff]  ;;  %v446_v42 = vld [vmem:[#allocation5 + $0x578] sm:$0xff]  ;;  %v1027_v43 = vpack.c.bf16 %v435_v35, %v429_v34 }
  0x94   : > { %946 = vmatprep.subr.bf16.mxu0 %v945_v52  ;;  %v440_v41 = vld [vmem:[#allocation5 + $0x548] sm:$0xff]  ;;  %v963_v44 = vpack.c.bf16 %v433_v38, %v427_v36  ;;  %v1029_v45 = vpack.c.bf16 %v448_v40, %v442_v39  ;;  %v441_v46 = vld [vmem:[#allocation5 + $0x550] sm:$0xff]  ;;  %v447_v47 = vld [vmem:[#allocation5 + $0x580] sm:$0xff] }
  0x95   : > { %1012 = vmatpush1.bf16.msra.mxu1 %v1011_v58  ;;  %v439_v48 = vld [vmem:[#allocation5 + $0x540] sm:$0xff]  ;;  %v965_v49 = vpack.c.bf16 %v446_v42, %v440_v41  ;;  %v445_v50 = vld [vmem:[#allocation5 + $0x570] sm:$0xff]  ;;  %v454_v51 = vld [vmem:[#allocation5 + $0x5b8] sm:$0xff]  ;;  %v1031_v55 = vpack.c.bf16 %v447_v47, %v441_v46 }
  0x96   : > { %1014 = vmatprep.subr.bf16.mxu1 %v1013_v60  ;;  %v460_v52 = vld [vmem:[#allocation5 + $0x5e8] sm:$0xff]  ;;  %v458_v54 = vld [vmem:[#allocation5 + $0x5d8] sm:$0xff]  ;;  %v967_v56 = vpack.c.bf16 %v445_v50, %v439_v48  ;;  %v453_v58 = vld [vmem:[#allocation5 + $0x5b0] sm:$0xff] }
  0x97   : > { %948 = vmatpush1.bf16.msra.mxu0 %v947_v59  ;;  %v452_v53 = vld [vmem:[#allocation5 + $0x5a8] sm:$0xff]  ;;  %v1033_v57 = vpack.c.bf16 %v460_v52, %v454_v51  ;;  %v459_v59 = vld [vmem:[#allocation5 + $0x5e0] sm:$0xff]  ;;  %v457_v62 = vld [vmem:[#allocation5 + $0x5d0] sm:$0xff] }
  0x98   : > { %950 = vmatprep.subr.bf16.mxu0 %v949_v0  ;;  %v451_v60 = vld [vmem:[#allocation5 + $0x5a0] sm:$0xff]  ;;  %v969_v61 = vpack.c.bf16 %v458_v54, %v452_v53  ;;  %v276_v63 = vld [vmem:[#allocation5 + $0x28] sm:$0xff]  ;;  %v282_v0 = vld [vmem:[#allocation5 + $0x58] sm:$0xff]  ;;  %v1035_v1 = vpack.c.bf16 %v459_v59, %v453_v58 }
  0x99   : > { %1016 = vmatpush1.bf16.msra.mxu1 %v1015_v6  ;;  %v971_v2 = vpack.c.bf16 %v457_v62, %v451_v60  ;;  %v1037_v3 = vpack.c.bf16 %v282_v0, %v276_v63  ;;  %v275_v4 = vld [vmem:[#allocation5 + $0x20] sm:$0xff]  ;;  %v281_v5 = vld [vmem:[#allocation5 + $0x50] sm:$0xff]  ;;  %v288_v6 = vld [vmem:[#allocation5 + $0x88] sm:$0xff] }
  0x9a   : > { %1018 = vmatprep.subr.bf16.mxu1 %v1017_v9  ;;  %v294_v7 = vld [vmem:[#allocation5 + $0xb8] sm:$0xff]  ;;  %v1039_v9 = vpack.c.bf16 %v281_v5, %v275_v4  ;;  %v287_v11 = vld [vmem:[#allocation5 + $0x80] sm:$0xff]  ;;  %v293_v12 = vld [vmem:[#allocation5 + $0xb0] sm:$0xff] }
  0x9b   : > { %952 = vmatpush1.bf16.msra.mxu0 %v951_v8  ;;  %v1637_v8 = vld [vmem:[%s1621_s4] sm:$0xff]  ;;  %v1041_v10 = vpack.c.bf16 %v294_v7, %v288_v6  ;;  %v306_v14 = vld [vmem:[#allocation5 + $0x118] sm:$0xff]  ;;  %v1043_v17 = vpack.c.bf16 %v293_v12, %v287_v11  ;;  %v1643_v18 = vld [vmem:[%s1621_s4 + $0x10] sm:$0xff] }
  0x9c   : > { %954 = vmatprep.subr.bf16.mxu0 %v953_v13  ;;  %v300_v13 = vld [vmem:[#allocation5 + $0xe8] sm:$0xff]  ;;  %v318_v24 = vld [vmem:[#allocation5 + $0x178] sm:$0xff]  ;;  %v1651_v26 = vld [vmem:[%s1621_s4 + $0x20] sm:$0xf] }
  0x9d   : > { %1020 = vmatpush1.bf16.msra.mxu1 %v1019_v19  ;;  %v268_v15 = vld [vmem:[%s1621_s4 + $0x18] sm:$0xff]  ;;  %v1045_v19 = vpack.c.bf16 %v306_v14, %v300_v13  ;;  %v1646_v22 = vld [vmem:[%s1621_s4 + $0x28] sm:$0xf]  ;;  %v311_v28 = vld [vmem:[#allocation5 + $0x140] sm:$0xff] }
  0x9e   : > { %1022 = vmatprep.subr.bf16.mxu1 %v1021_v21  ;;  %v305_v21 = vld [vmem:[#allocation5 + $0x110] sm:$0xff]  ;;  %v312_v23 = vld [vmem:[#allocation5 + $0x148] sm:$0xff]  ;;  %v323_v34 = vld [vmem:[#allocation5 + $0x1a0] sm:$0xff] }
  0x9f   : > { %956 = vmatpush1.bf16.msra.mxu0 %v955_v20  ;;  %v299_v20 = vld [vmem:[#allocation5 + $0xe0] sm:$0xff]  ;;  %v1049_v27 = vpack.c.bf16 %v318_v24, %v312_v23  ;;  %v317_v29 = vld [vmem:[#allocation5 + $0x170] sm:$0xff]  ;;  %v324_v30 = vld [vmem:[#allocation5 + $0x1a8] sm:$0xff] }
  0xa0   : > { %958 = vmatprep.subr.bf16.mxu0 %v957_v25  ;;  %v1047_v25 = vpack.c.bf16 %v305_v21, %v299_v20  ;;  %v329_v35 = vld [vmem:[#allocation5 + $0x1d0] sm:$0xff]  ;;  %v336_v36 = vld [vmem:[#allocation5 + $0x208] sm:$0xff]  ;;  %v335_v40 = vld [vmem:[#allocation5 + $0x200] sm:$0xff] }
  0xa1   : > { %1024 = vmatpush1.bf16.msra.mxu1 %v1023_v31  ;;  %v330_v31 = vld [vmem:[#allocation5 + $0x1d8] sm:$0xff]  ;;  %v1055_v38 = vpack.c.bf16 %v329_v35, %v323_v34  ;;  %v341_v41 = vld [vmem:[#allocation5 + $0x230] sm:$0xff]  ;;  %v348_v42 = vld [vmem:[#allocation5 + $0x268] sm:$0xff] }
  0xa2   : > { %1026 = vmatprep.subr.bf16.mxu1 %v1025_v33  ;;  %v1053_v33 = vpack.c.bf16 %v330_v31, %v324_v30  ;;  %v347_v46 = vld [vmem:[#allocation5 + $0x260] sm:$0xff]  ;;  %v353_v47 = vld [vmem:[#allocation5 + $0x290] sm:$0xff]  ;;  %v360_v48 = vld [vmem:[#allocation5 + $0x2c8] sm:$0xff] }
  0xa3   : > { %960 = vmatpush1.bf16.msra.mxu0 %v959_v32  ;;  %v1051_v32 = vpack.c.bf16 %v317_v29, %v311_v28  ;;  %v359_v51 = vld [vmem:[#allocation5 + $0x2c0] sm:$0xff]  ;;  %v365_v52 = vld [vmem:[#allocation5 + $0x2f0] sm:$0xff]  ;;  %v372_v53 = vld [vmem:[#allocation5 + $0x328] sm:$0xff] }
  0xa4   : > { %962 = vmatprep.subr.bf16.mxu0 %v961_v37  ;;  %v342_v37 = vld [vmem:[#allocation5 + $0x238] sm:$0xff]  ;;  %v377_v58 = vld [vmem:[#allocation5 + $0x350] sm:$0xff]  ;;  %v384_v59 = vld [vmem:[#allocation5 + $0x388] sm:$0xff] }
  0xa5   : > { %1028 = vmatpush1.bf16.msra.mxu1 %v1027_v43  ;;  %v1057_v39 = vpack.c.bf16 %v342_v37, %v336_v36  ;;  %v354_v43 = vld [vmem:[#allocation5 + $0x298] sm:$0xff]  ;;  %v383_v63 = vld [vmem:[#allocation5 + $0x380] sm:$0xff]  ;;  %v389_v0 = vld [vmem:[#allocation5 + $0x3b0] sm:$0xff] }
  0xa6   : > { %1030 = vmatprep.subr.bf16.mxu1 %v1029_v45  ;;  %v1061_v45 = vpack.c.bf16 %v354_v43, %v348_v42  ;;  %v378_v54 = vld [vmem:[#allocation5 + $0x358] sm:$0xff]  ;;  %v395_v5 = vld [vmem:[#allocation5 + $0x3e0] sm:$0xff]  ;;  %v401_v6 = vld [vmem:[#allocation5 + $0x410] sm:$0xff]  ;;  %v465_v43 = vlaneseq }
  0xa7   : > { %964 = vmatpush1.bf16.msra.mxu0 %v963_v44  ;;  %v1059_v44 = vpack.c.bf16 %v341_v41, %v335_v40  ;;  %v390_v60 = vld [vmem:[#allocation5 + $0x3b8] sm:$0xff]  ;;  %v408_v7 = vld [vmem:[#allocation5 + $0x448] sm:$0xff]  ;;  %v407_v12 = vld [vmem:[#allocation5 + $0x440] sm:$0xff] }
  0xa8   : > { %966 = vmatprep.subr.bf16.mxu0 %v965_v49  ;;  %v1063_v49 = vpack.c.bf16 %v353_v47, %v347_v46  ;;  %v1073_v62 = vpack.c.bf16 %v390_v60, %v384_v59  ;;  %v413_v13 = vld [vmem:[#allocation5 + $0x470] sm:$0xff]  ;;  %v420_v14 = vld [vmem:[#allocation5 + $0x4a8] sm:$0xff]  ;;  %v419_v20 = vld [vmem:[#allocation5 + $0x4a0] sm:$0xff] }
  0xa9   : > { %1032 = vmatpush1.bf16.msra.mxu1 %v1031_v55  ;;  %v1067_v55 = vpack.c.bf16 %v365_v52, %v359_v51  ;;  %v425_v21 = vld [vmem:[#allocation5 + $0x4d0] sm:$0xff]  ;;  %v432_v23 = vld [vmem:[#allocation5 + $0x508] sm:$0xff]  ;;  %v438_v24 = vld [vmem:[#allocation5 + $0x538] sm:$0xff] }
  0xaa   : > { %1034 = vmatprep.subr.bf16.mxu1 %v1033_v57  ;;  %v371_v57 = vld [vmem:[#allocation5 + $0x320] sm:$0xff]  ;;  %v437_v29 = vld [vmem:[#allocation5 + $0x530] sm:$0xff]  ;;  %v444_v30 = vld [vmem:[#allocation5 + $0x568] sm:$0xff] }
  0xab   : > { %968 = vmatpush1.bf16.msra.mxu0 %v967_v56  ;;  %v1069_v56 = vpack.c.bf16 %v378_v54, %v372_v53  ;;  %v431_v28 = vld [vmem:[#allocation5 + $0x500] sm:$0xff]  ;;  %v450_v31 = vld [vmem:[#allocation5 + $0x598] sm:$0xff]  ;;  %v449_v35 = vld [vmem:[#allocation5 + $0x590] sm:$0xff] }
  0xac   : > { %970 = vmatprep.subr.bf16.mxu0 %v969_v61  ;;  %v1071_v61 = vpack.c.bf16 %v377_v58, %v371_v57  ;;  %v443_v34 = vld [vmem:[#allocation5 + $0x560] sm:$0xff]  ;;  %v456_v36 = vld [vmem:[#allocation5 + $0x5c8] sm:$0xff]  ;;  %v462_v37 = vld [vmem:[#allocation5 + $0x5f8] sm:$0xff] }
  0xad   : > { %1036 = vmatpush1.bf16.msra.mxu1 %v1035_v1  ;;  %v396_v1 = vld [vmem:[#allocation5 + $0x3e8] sm:$0xff]  ;;  %v455_v40 = vld [vmem:[#allocation5 + $0x5c0] sm:$0xff]  ;;  %v461_v41 = vld [vmem:[#allocation5 + $0x5f0] sm:$0xff] }
  0xae   : > { %1101 = vmatprep.subr.bf16.mxu1 %v1037_v3  ;;  %v1099_v42 = vpack.c.bf16 %v461_v41, %v455_v40  ;;  %v463_v46 = vld [vmem:[#allocation7] sm:$0x3f] }
  0xaf   : > { %972 = vmatpush1.bf16.msra.mxu0 %v971_v2  ;;  %v402_v2 = vld [vmem:[#allocation5 + $0x418] sm:$0xff] }
  0xb0   : > { %1038 = vmatprep.subr.bf16.mxu0 %v1037_v3  ;;  %643 = vmatmul.mubr.f32.vlgmr.msra.gmra.mrb[0].mxu1 %v1637_v8  ;;  %v1075_v3 = vpack.c.bf16 %v389_v0, %v383_v63  ;;  %v1077_v4 = vpack.c.bf16 %v402_v2, %v396_v1 }
  0xb1   : > { %1117 = vmatpush1.bf16.msra.mxu1 %v1039_v9  ;;  %648 = vmatprep.mubr.f32.mxu1 %v268_v15 }
  0xb2   : > { %560 = vmatmul.mubr.f32.vlgmr.msra.gmra.mrb[0].mxu0 %v1637_v8  ;;  %1102 = vmatprep.subr.bf16.mxu1 %v1041_v10 }
  0xb3   : > { %1040 = vmatpush1.bf16.msra.mxu0 %v1039_v9  ;;  %565 = vmatprep.mubr.f32.mxu0 %v268_v15  ;;  %v414_v9 = vld [vmem:[#allocation5 + $0x478] sm:$0xff] }
  0xb4   : > { %1042 = vmatprep.subr.bf16.mxu0 %v1041_v10  ;;  %649 = vmatmul.mubr.f32.gmra.mrb[2].mxu1 %v1643_v18  ;;  %v1079_v10 = vpack.c.bf16 %v401_v6, %v395_v5  ;;  %v1081_v11 = vpack.c.bf16 %v414_v9, %v408_v7 }
  0xb5   : > { %1118 = vmatpush1.bf16.msra.mxu1 %v1043_v17  ;;  %654 = vmatprep.mubr.f32.mxu1 %v1646_v22 }
  0xb6   : > { %1103 = vmatprep.subr.bf16.mxu1 %v1045_v19  ;;  %566 = vmatmul.mubr.f32.gmra.mrb[2].mxu0 %v1643_v18 }
  0xb7   : > { %1044 = vmatpush1.bf16.msra.mxu0 %v1043_v17  ;;  %571 = vmatprep.mubr.f32.mxu0 %v1646_v22  ;;  %v1083_v17 = vpack.c.bf16 %v413_v13, %v407_v12 }
  0xb8   : > { %1046 = vmatprep.subr.bf16.mxu0 %v1045_v19  ;;  %655 = vmatmul.mubr.f32.gmra.mrb[4].mxu1 %v1651_v26 }
  0xb9   : > { %1119 = vmatpush1.bf16.msra.mxu1 %v1047_v25  ;;  %731 = vmatprep.mubr.f32.mxu1 %v268_v15  ;;  %v426_v15 = vld [vmem:[#allocation5 + $0x4d8] sm:$0xff] }
  0xba   : > { %1104 = vmatprep.subr.bf16.mxu1 %v1049_v27  ;;  %572 = vmatmul.mubr.f32.gmra.mrb[4].mxu0 %v1651_v26  ;;  %v1085_v19 = vpack.c.bf16 %v426_v15, %v420_v14 }
  0xbb   : > { %1048 = vmatpush1.bf16.msra.mxu0 %v1047_v25  ;;  %725 = vmatprep.mubr.f32.mxu0 %v1632_v16  ;;  %v366_v16 = vld [vmem:[#allocation5 + $0x2f8] sm:$0xff]  ;;  %v1087_v25 = vpack.c.bf16 %v425_v21, %v419_v20 }
  0xbc   : > { %1050 = vmatprep.subr.bf16.mxu0 %v1049_v27  ;;  %v1065_v50 = vpack.c.bf16 %v366_v16, %v360_v48  ;;  %v1089_v27 = vpack.c.bf16 %v438_v24, %v432_v23 }
  0xbd   : > { %1120 = vmatpush1.bf16.msra.mxu1 %v1051_v32 }
  0xbe   : > { %1105 = vmatprep.subr.bf16.mxu1 %v1053_v33 }
  0xbf   : > { %1052 = vmatpush1.bf16.msra.mxu0 %v1051_v32  ;;  %v1091_v32 = vpack.c.bf16 %v437_v29, %v431_v28 }
  0xc0   : > { %1054 = vmatprep.subr.bf16.mxu0 %v1053_v33  ;;  %v1093_v33 = vpack.c.bf16 %v450_v31, %v444_v30 }
  0xc1   : > { %1121 = vmatpush1.bf16.msra.mxu1 %v1055_v38 }
  0xc2   : > { %1106 = vmatprep.subr.bf16.mxu1 %v1057_v39 }
  0xc3   : > { %1056 = vmatpush1.bf16.msra.mxu0 %v1055_v38  ;;  %v1095_v38 = vpack.c.bf16 %v449_v35, %v443_v34 }
  0xc4   : > { %1058 = vmatprep.subr.bf16.mxu0 %v1057_v39  ;;  %v1097_v39 = vpack.c.bf16 %v462_v37, %v456_v36 }
  0xc5   : > { %1122 = vmatpush1.bf16.msra.mxu1 %v1059_v44 }
  0xc6   : > { %1107 = vmatprep.subr.bf16.mxu1 %v1061_v45 }
  0xc7   : > { %1060 = vmatpush1.bf16.msra.mxu0 %v1059_v44  ;;  %v466_v44 = vshrl.u32 %v465_v43, 7 }
  0xc8   : > { %1062 = vmatprep.subr.bf16.mxu0 %v1061_v45 }
  0xc9   : > { %1123 = vmatpush1.bf16.msra.mxu1 %v1063_v49  ;;  %v475_v45 = vsub.s32 2, %v466_v44  ;;  %v479_v47 = vsub.s32 3, %v466_v44  ;;  %v467_v48 = vsub.s32 0, %v466_v44  ;;  %v471_v16 = vsub.s32 1, %v466_v44 }
  0xca   : > { %1108 = vmatprep.subr.bf16.mxu1 %v1065_v50 }
  0xcb   : > { %1064 = vmatpush1.bf16.msra.mxu0 %v1063_v49  ;;  %v476_v49 = vrot.slane %v463_v46, %v475_v45  ;;  %v468_v51 = vrot.slane %v463_v46, %v467_v48  ;;  %v472_v52 = vrot.slane %v463_v46, %v471_v16 }
  0xcc   : > { %1066 = vmatprep.subr.bf16.mxu0 %v1065_v50  ;;  %v480_v50 = vrot.slane %v463_v46, %v479_v47 }
  0xcd   : > { %1124 = vmatpush1.bf16.msra.mxu1 %v1067_v55 }
  0xce   : > { %1109 = vmatprep.subr.bf16.mxu1 %v1069_v56 }
  0xcf   : > { %1068 = vmatpush1.bf16.msra.mxu0 %v1067_v55 }
  0xd0   : > { %1070 = vmatprep.subr.bf16.mxu0 %v1069_v56 }
  0xd1   : > { %1125 = vmatpush1.bf16.msra.mxu1 %v1071_v61 }
  0xd2   : > { %1110 = vmatprep.subr.bf16.mxu1 %v1073_v62 }
  0xd3   : > { %1072 = vmatpush1.bf16.msra.mxu0 %v1071_v61 }
  0xd4   : > { %1074 = vmatprep.subr.bf16.mxu0 %v1073_v62 }
  0xd5   : > { %1126 = vmatpush1.bf16.msra.mxu1 %v1075_v3 }
  0xd6   : > { %1111 = vmatprep.subr.bf16.mxu1 %v1077_v4 }
  0xd7   : > { %1076 = vmatpush1.bf16.msra.mxu0 %v1075_v3 }
  0xd8   : > { %1078 = vmatprep.subr.bf16.mxu0 %v1077_v4 }
  0xd9   : > { %1127 = vmatpush1.bf16.msra.mxu1 %v1079_v10 }
  0xda   : > { %1112 = vmatprep.subr.bf16.mxu1 %v1081_v11 }
  0xdb   : > { %1080 = vmatpush1.bf16.msra.mxu0 %v1079_v10  ;;  %v483_v10 = vsub.s32 4, %v466_v44 }
  0xdc   : > { %1082 = vmatprep.subr.bf16.mxu0 %v1081_v11  ;;  %v487_v11 = vsub.s32 5, %v466_v44 }
  0xdd   : > { %1128 = vmatpush1.bf16.msra.mxu1 %v1083_v17  ;;  %v484_v12 = vrot.slane %v463_v46, %v483_v10 }
  0xde   : > { %1113 = vmatprep.subr.bf16.mxu1 %v1085_v19  ;;  %v488_v13 = vrot.slane %v463_v46, %v487_v11 }
  0xdf   : > { %1084 = vmatpush1.bf16.msra.mxu0 %v1083_v17 }
  0xe0   : > { %1086 = vmatprep.subr.bf16.mxu0 %v1085_v19 }
  0xe1   : > { %1129 = vmatpush1.bf16.msra.mxu1 %v1087_v25 }
  0xe2   : > { %1114 = vmatprep.subr.bf16.mxu1 %v1089_v27 }
  0xe3   : > { %1088 = vmatpush1.bf16.msra.mxu0 %v1087_v25 }
  0xe4   : > { %1090 = vmatprep.subr.bf16.mxu0 %v1089_v27 }
  0xe5   : > { %1130 = vmatpush1.bf16.msra.mxu1 %v1091_v32 }
  0xe6   : > { %1115 = vmatprep.subr.bf16.mxu1 %v1093_v33 }
  0xe7   : > { %1092 = vmatpush1.bf16.msra.mxu0 %v1091_v32 }
  0xe8   : > { %1094 = vmatprep.subr.bf16.mxu0 %v1093_v33 }
  0xe9   : > { %1131 = vmatpush1.bf16.msra.mxu1 %v1095_v38 }
  0xea   : > { %1116 = vmatprep.subr.bf16.mxu1 %v1097_v39 }
  0xeb   : > { %1096 = vmatpush1.bf16.msra.mxu0 %v1095_v38 }
  0xec   : > { %1098 = vmatprep.subr.bf16.mxu0 %v1097_v39 }
  0xed   : > { %1132 = vmatpush1.bf16.msra.mxu1 %v1099_v42 }
  0xef   : > { %1100 = vmatpush1.bf16.msra.mxu0 %v1099_v42 }
  0xf0   : > { %732 = vmatmul.mubr.f32.vlgmr.msra.gmra.mrb[6].mxu1 %v1643_v18 }
  0xf1   : > { %737 = vmatprep.mubr.f32.mxu1 %v1646_v22 }
  0xf2   : > { %726 = vmatmul.mubr.f32.vlgmr.msra.gmra.mrb[6].mxu0 %v1637_v8 }
  0xf4   : > { %738 = vmatmul.mubr.f32.gmra.mrb[8].mxu1 %v1651_v26 }
 0x183   : > { %v644_v53 = vpop.f32.mrb[0].mxu1 }
 0x184   : > { %v645_v18 = vadd.f32 %v644_v53, %v476_v49  ;;  %v646_v54 = vpop.f32.mrb[1].mxu1 }
 0x185   : > { %v561_v8 = vpop.f32.mrb[0].mxu0  ;;  %v647_v55 = vadd.f32 %v646_v54, %v480_v50 }
 0x186   : > { %v562_v22 = vadd.f32 %v561_v8, %v468_v51  ;;  %v563_v56 = vpop.f32.mrb[1].mxu0  ;;  %746 = vst [vmem:[%s1663_s22 + $0x10] sm:$0xff] %v645_v18 }
 0x187   : > { %v564_v26 = vadd.f32 %v563_v56, %v472_v52  ;;  %747 = vst [vmem:[%s1663_s22 + $0x18] sm:$0xff] %v647_v55  ;;  %v650_v57 = vpop.f32.mrb[2].mxu1 }
 0x188   : > { %744 = vst [vmem:[%s1663_s22] sm:$0xff] %v562_v22  ;;  %v651_v58 = vadd.f32 %v650_v57, %v476_v49  ;;  %v652_v59 = vpop.f32.mrb[3].mxu1 }
 0x189   : > { %745 = vst [vmem:[%s1663_s22 + $0x8] sm:$0xff] %v564_v26  ;;  %v653_v60 = vadd.f32 %v652_v59, %v480_v50  ;;  %v567_v61 = vpop.f32.mrb[2].mxu0 }
 0x18a   : > { %752 = vst [vmem:[%s1663_s22 + $0x40] sm:$0xff] %v651_v58  ;;  %v568_v62 = vadd.f32 %v567_v61, %v468_v51  ;;  %v569_v0 = vpop.f32.mrb[3].mxu0 }
 0x18b   : > { %753 = vst [vmem:[%s1663_s22 + $0x48] sm:$0xff] %v653_v60  ;;  %v656_v63 = vpop.f32.mrb[4].mxu1  ;;  %v570_v2 = vadd.f32 %v569_v0, %v472_v52 }
 0x18c   : > { %v657_v1 = vadd.f32 %v656_v63, %v476_v49  ;;  %v658_v3 = vpop.f32.mrb[5].mxu1  ;;  %750 = vst [vmem:[%s1663_s22 + $0x30] sm:$0xff] %v568_v62 }
 0x18d   : > { %v659_v4 = vadd.f32 %v658_v3, %v480_v50  ;;  %751 = vst [vmem:[%s1663_s22 + $0x38] sm:$0xff] %v570_v2  ;;  %v573_v5 = vpop.f32.mrb[4].mxu0 }
 0x18e   : > { %758 = vst [vmem:[%s1663_s22 + $0x70] sm:$0xf] %v657_v1  ;;  %v574_v6 = vadd.f32 %v573_v5, %v468_v51  ;;  %v575_v7 = vpop.f32.mrb[5].mxu0 }
 0x18f   : > { %759 = vst [vmem:[%s1663_s22 + $0x78] sm:$0xf] %v659_v4  ;;  %v576_v9 = vadd.f32 %v575_v7, %v472_v52 }
 0x190   : > { %756 = vst [vmem:[%s1663_s22 + $0x60] sm:$0xf] %v574_v6 }
 0x191   : > { %757 = vst [vmem:[%s1663_s22 + $0x68] sm:$0xf] %v576_v9 }
 0x1c3   : > { %v733_v14 = vpop.f32.mrb[6].mxu1 }
 0x1c4   : > { %v734_v15 = vadd.f32 %v733_v14, %v484_v12  ;;  %v735_v17 = vpop.f32.mrb[7].mxu1 }
 0x1c5   : > { %v727_v19 = vpop.f32.mrb[6].mxu0  ;;  %v736_v20 = vadd.f32 %v735_v17, %v488_v13 }
 0x1c6   : > { %v728_v21 = vadd.f32 %v727_v19, %v484_v12  ;;  %v729_v23 = vpop.f32.mrb[7].mxu0  ;;  %754 = vst [vmem:[%s1663_s22 + $0x50] sm:$0xff] %v734_v15 }
 0x1c7   : > { %v730_v24 = vadd.f32 %v729_v23, %v488_v13  ;;  %755 = vst [vmem:[%s1663_s22 + $0x58] sm:$0xff] %v736_v20  ;;  %v739_v25 = vpop.f32.mrb[8].mxu1 }
 0x1c8   : > { %748 = vst [vmem:[%s1663_s22 + $0x20] sm:$0xff] %v728_v21  ;;  %v740_v27 = vadd.f32 %v739_v25, %v484_v12  ;;  %v741_v28 = vpop.f32.mrb[9].mxu1 }
 0x1c9   : > { %749 = vst [vmem:[%s1663_s22 + $0x28] sm:$0xff] %v730_v24  ;;  %v742_v29 = vadd.f32 %v741_v28, %v488_v13 }
 0x1ca   : > { %760 = vst [vmem:[%s1663_s22 + $0x80] sm:$0xf] %v740_v27 }
 0x1cb   : > { %761 = vst [vmem:[%s1663_s22 + $0x88] sm:$0xf] %v742_v29 }
 0x1cc   : > { %1326 = shalt.err (!%p1323_p2)
}
 0x1cd   : > { %s1327_s9 = scalar_lea.hbm %s1686_s15, 2304  ;;  %s1331_s29 = scalar_lea.hbm %s1742_s3, 4608 }
 0x1ce   : > { %p1328_p0 = scmp.ne.s32.totalorder %s1686_s15, %s1327_s9  ;;  %p1332_p6 = scmp.lt.u32.totalorder %s1686_s15, %s1742_s3 }
 0x1cf   : > { %p1333_p7 = scmp.lt.u32.totalorder %s1331_s29, %s1327_s9  ;;  %p1335_p8 = scmp.lt.u32.totalorder %s1327_s9, %s1686_s15 }
 0x1d0   : > { %p1329_p4 = pnand %p1328_p0, %p1757_p12 }
 0x1d1   : > { %p1334_p11 = por %p1333_p7, %p1332_p6 }
 0x1d2   : > { %p1330_p13 = pneg %p1329_p4 }
 0x1d3   : > { %p1336_p1 = por %p1335_p8, %p1334_p11 }
 0x1d5   : > { %p1337_p10 = pnand %p1336_p1, %p1330_p13 }
 0x1d7   : > { %1340 = shalt.err (!%p1337_p10)
}
 0x1d8   : > { %s1409_s22 = smov 768   ;;  %s1410_s24 = smov 48  }
 0x1d9   : > { %1148 = dma.vmem_to_hbm [thread:$0]  (%p1757_p12), %s1688_s28, 2304, %s1686_s15, %s763_s26, %s1409_s22, %s1409_s22, %s1410_s24  }
 0x1da PF: > { %s796_s6 = sand.u32 1, %s1379_s12   ;;  %p1758_p3 = scmp.ne.s32.totalorder %s1750_s23, 0 }
 0x1db   : > { %p1759_p5 = scmp.ge.s32.totalorder %s1399_s17, 2  ;;  %s797_s8 = scalar_lea.sflag [#allocation4], %s796_s6 }
 0x1dd   : > { %p1162_p9 = pnand %p1759_p5, %p1758_p3 }
 0x1df   : > { %1374 = dma.done.wait (!%p1162_p9), %s797_s8, 2304  }
 0x1e0   : > { %1376 = vsyncadd (!%p1162_p9), %s797_s8, 4294964992  ;;  %s20_s17 = sadd.s32 1, %s1399_s17   ;;  %s1760_s12 = smov %s1383_s13 }
 0x1e1   : > { %p17_p2 = scmp.ge.s32.totalorder %s20_s17, 4   ;;  %s1761_s13 = smov %s1387_s14 }
 0x1e2   : > { %s1762_s14 = smov %s1576_s30  ;;  %s1763_s15 = smov %s1395_s16 }
 0x1e3   : > { %s1764_s16 = smov %s1766_s11  ;;  %19 = sbr.rel (!%p17_p2) target bundleno = 7 (0x7), region = 87 }
 0x1ea   :  { %802 = vsyncpa [#allocation3], 1 }
 0x1eb   :  { %804 = vsyncpa [#allocation3 + $0x1], 1 }
 0x1ec   :  { %805 = vsyncpa [#allocation6], 1 }
 0x1ed   :  { %806 = vsyncpa [#allocation4], 1 }
 0x1ee   :  { %808 = vsyncpa [#allocation4 + $0x1], 1 }

</bundles_post_ra>
